<compile_context>
chip_gen: v5e
topology: v5e:2x2
jax: 0.10.0
libtpu: 0.0.40
codegen_flags: <defaults>
</compile_context>

<pallas_src>
import functools
import math

import jax
import jax.numpy as jnp
from jax import lax
from jax.experimental import pallas as pl
from jax.experimental.pallas import tpu as pltpu


# ----------------------------------------------------------------------------
# In-kernel counter-based PRNG (plain VPU integer ops) + Box-Muller
# ----------------------------------------------------------------------------
_LOW1 = 0x7FEB352D
_LOW2 = 0x846CA68B
_PHI = 0x9E3779B9
_STREAM = 0x85EBCA6B


def _mix32(x):
    """32-bit integer finalizer (lowbias32) — good avalanche, VPU-only ops."""
    x = x ^ (x >> jnp.uint32(16))
    x = x * jnp.uint32(_LOW1)
    x = x ^ (x >> jnp.uint32(15))
    x = x * jnp.uint32(_LOW2)
    x = x ^ (x >> jnp.uint32(16))
    return x


def _uniform01(shape, key_u32, stream):
    """Counter-based uniforms in [0, 1); shape = (c, rows, 128)."""
    i0 = lax.broadcasted_iota(jnp.int32, shape, 0)
    i1 = lax.broadcasted_iota(jnp.int32, shape, 1)
    i2 = lax.broadcasted_iota(jnp.int32, shape, 2)
    idx = ((i0 * shape[1] + i1) * shape[2] + i2).astype(jnp.uint32)
    h = _mix32(idx * jnp.uint32(_PHI) + key_u32
               + jnp.uint32((stream * _STREAM) & 0xFFFFFFFF))
    h = _mix32(h ^ key_u32)
    # top 24 bits -> float32 in [0, 1)
    return ((h >> jnp.uint32(8)).astype(jnp.int32).astype(jnp.float32)
            * jnp.float32(1.0 / (1 << 24)))


def _gaussian(n_ch, rows, lanes, key_u32):
    """Standard normal noise of shape (n_ch, rows, lanes) via Box-Muller.
    Uses both branches (cos & sin) when n_ch is even -> half the PRNG/log/sqrt."""
    two_pi = jnp.float32(2.0 * math.pi)
    if n_ch % 2 == 0 and n_ch >= 2:
        half = n_ch // 2
        u1 = _uniform01((half, rows, lanes), key_u32, 0)
        u2 = _uniform01((half, rows, lanes), key_u32, 1)
        r = jnp.sqrt(-2.0 * jnp.log(1.0 - u1))      # 1-u1 in (0, 1] -> log finite
        theta = two_pi * u2
        return jnp.concatenate([r * jnp.cos(theta), r * jnp.sin(theta)], axis=0)
    u1 = _uniform01((n_ch, rows, lanes), key_u32, 0)
    u2 = _uniform01((n_ch, rows, lanes), key_u32, 1)
    r = jnp.sqrt(-2.0 * jnp.log(1.0 - u1))
    return r * jnp.cos(two_pi * u2)


# ----------------------------------------------------------------------------
# Fused Pallas kernel: ALL T reverse-diffusion steps for one (batch, row) block
# ----------------------------------------------------------------------------
def _sampler_kernel(coeff_ref, temb_ref, w_ref, seed_ref, x_ref, o_ref):
    # coeff_ref: SMEM (3, T) f32 : rows [coeff1, coeff2, sqrt(var)], reversed time
    # temb_ref:  SMEM (C, T) f32 : time-embedding bias of synthetic eps-model
    # w_ref:     SMEM (C, C) f32 : 1x1-conv weight of synthetic eps-model
    # seed_ref:  SMEM (1,)  i32  : base RNG seed
    # x_ref:     VMEM (1, C, TS, 128) : x_T block  (pixels packed sublane x lane)
    # o_ref:     VMEM (1, C, TS, 128) : x_0 block
    T = coeff_ref.shape[1]
    C = w_ref.shape[0]

    b = pl.program_id(0)
    r = pl.program_id(1)
    blk = b * pl.num_programs(1) + r
    base_seed = seed_ref[0]

    x0 = x_ref[0]                                   # (C, TS, 128) f32
    rows, lanes = x0.shape[1], x0.shape[2]

    def mean_step(t, x):
        # eps = W @ x + temb[t]   (C*C unrolled broadcast-FMAs, fully packed slabs)
        c1 = coeff_ref[0, t]
        c2 = coeff_ref[1, t]
        eps_rows = []
        for c in range(C):
            acc = w_ref[c, 0] * x[0]
            for k in range(1, C):
                acc = acc + w_ref[c, k] * x[k]
            eps_rows.append(acc + temb_ref[c, t])
        eps = jnp.stack(eps_rows, axis=0)
        return c1 * x - c2 * eps                    # xt_prev_mean

    def noisy_step(t, x):
        mean = mean_step(t, x)
        sv = coeff_ref[2, t]                        # sqrt(var_t)
        key = (base_seed + t * jnp.int32(1000003)
               + blk * jnp.int32(7919)).astype(jnp.uint32)
        noise = _gaussian(C, rows, lanes, key)
        return mean + sv * noise

    # Reversed-time index t=0 <-> time_step T-1. Noise on every step except the
    # last (time_step == 0), where the reference uses noise = 0 -> skip PRNG.
    x = lax.fori_loop(0, T - 1, noisy_step, x0)
    x = mean_step(T - 1, x)
    o_ref[0] = jnp.clip(x, -1.0, 1.0)               # fused clip, lane-dense store


# ----------------------------------------------------------------------------
# Tiling helper + jitted wrapper around the single pallas_call
# ----------------------------------------------------------------------------
def _pick_row_tile(n_rows, n_ch, max_block_bytes=4 * 1024 * 1024):
    """Largest legal row tile (multiple of 8, or full extent) under a VMEM budget."""
    max_ts = max(1, max_block_bytes // (n_ch * 128 * 4))
    if n_rows <= max_ts:
        return n_rows
    best = None
    t = 8
    while t <= max_ts:
        if n_rows % t == 0:
            best = t
        t += 8
    return best if best is not None else n_rows     # full extent is always legal


@functools.partial(jax.jit, static_argnames=("ts",))
def _sample_fused(coeffs_rev, temb_rev, w, seed, x_T, *, ts):
    B, C, H, W = x_T.shape
    n_rows = (H * W) // 128
    # NCHW -> (B, C, HW/128, 128): free view reshape (no transpose); pixels land on
    # (sublane, lane) so all per-channel VPU math is fully packed.
    x4d = x_T.reshape(B, C, n_rows, 128).astype(jnp.float32)

    out = pl.pallas_call(
        _sampler_kernel,
        out_shape=jax.ShapeDtypeStruct((B, C, n_rows, 128), jnp.float32),
        grid_spec=pltpu.PrefetchScalarGridSpec(
            num_scalar_prefetch=4,                   # coeffs, temb, W, seed -> SMEM
            grid=(B, n_rows // ts),                  # batch x pixel-row blocks
            in_specs=[pl.BlockSpec((1, C, ts, 128), lambda b, r, *_: (b, 0, r, 0))],
            out_specs=pl.BlockSpec((1, C, ts, 128), lambda b, r, *_: (b, 0, r, 0)),
        ),
        compiler_params=pltpu.CompilerParams(
            dimension_semantics=("parallel", "parallel"),
        ),
    )(coeffs_rev, temb_rev, w, seed, x4d)
    return out.reshape(B, C, H, W)


# ----------------------------------------------------------------------------
# Sampler wrapper (schedule math = glue; all T steps = one Pallas kernel)
# ----------------------------------------------------------------------------
class GaussianDiffusionSampler:
    def __init__(self, model_w, model_temb, beta_1, beta_T, T):
        # TODO(synk): the reference wraps an arbitrary nn.Module `model`; here it
        # is synthesized as eps(x, t) = W @ x + temb[t] (1x1 conv + time bias).
        self.T = T
        self.model_w = model_w.astype(jnp.float32)          # (C, C)
        self.model_temb = model_temb.astype(jnp.float32)    # (T, C)

        betas = jnp.linspace(beta_1, beta_T, T).astype(jnp.float32)
        alphas = 1.0 - betas
        alphas_bar = jnp.cumprod(alphas, axis=0)
        alphas_bar_prev = jnp.concatenate(
            [jnp.ones((1,), jnp.float32), alphas_bar])[:T]

        self.betas = betas
        self.coeff1 = jnp.sqrt(1.0 / alphas)
        self.coeff2 = self.coeff1 * (1.0 - alphas) / jnp.sqrt(1.0 - alphas_bar)
        self.posterior_var = betas * (1.0 - alphas_bar_prev) / (1.0 - alphas_bar)
        # var = cat([posterior_var[1:2], betas[1:]])  (as in the reference)
        var = jnp.concatenate([self.posterior_var[1:2], betas[1:]])
        sqrt_var = jnp.sqrt(var).at[0].set(0.0)      # time_step==0: noise coeff = 0

        # Tables with the long T axis LAST, in reversed-time order so index t=0
        # corresponds to time_step = T-1.
        rev = jnp.arange(T - 1, -1, -1)
        self._coeffs_rev = jnp.stack(
            [self.coeff1[rev], self.coeff2[rev], sqrt_var[rev]], axis=0
        ).astype(jnp.float32)                                # (3, T)
        self._temb_rev = self.model_temb[rev].T              # (C, T)

    def __call__(self, x_T, noise_key):
        B, C, H, W = x_T.shape
        assert (H * W) % 128 == 0, "H*W must be a multiple of 128 for lane packing"
        seed = jax.random.randint(
            noise_key, (1,), 0, jnp.iinfo(jnp.int32).max, dtype=jnp.int32)
        ts = _pick_row_tile((H * W) // 128, C)
        return _sample_fused(self._coeffs_rev, self._temb_rev, self.model_w,
                             seed, x_T, ts=ts)


# ----------------------------------------------------------------------------
if __name__ == "__main__":
    B, C, H, W = 2, 4, 16, 16
    T = 8
    beta_1, beta_T = 1e-4, 0.02

    key = jax.random.PRNGKey(0)
    k_x, k_w, k_temb, k_noise = jax.random.split(key, 4)

    x_T = jax.random.normal(k_x, (B, C, H, W), jnp.float32)
    # Deterministic synthetic eps-model parameters.
    model_w = 0.1 * jax.random.normal(k_w, (C, C), jnp.float32)
    model_temb = 0.05 * jax.random.normal(k_temb, (T, C), jnp.float32)

    sampler = GaussianDiffusionSampler(model_w, model_temb, beta_1, beta_T, T)
    x_0 = jax.block_until_ready(sampler(x_T, k_noise))

    assert x_0.shape == (B, C, H, W)
    assert not bool(jnp.any(jnp.isnan(x_0))), "nan in tensor."
    assert bool(jnp.all(jnp.abs(x_0) <= 1.0)), "clip failed."
    print("KERNEL_OK")
</pallas_src>

<mosaic_0001>
module attributes {stable_mosaic.version = 11 : i64} {
  func.func @_sampler_kernel(%arg0: i32, %arg1: i32, %arg2: memref<3x8xf32, #tpu.memory_space<smem>>, %arg3: memref<4x8xf32, #tpu.memory_space<smem>>, %arg4: memref<4x4xf32, #tpu.memory_space<smem>>, %arg5: memref<1xi32, #tpu.memory_space<smem>>, %arg6: memref<1x4x2x128xf32, #tpu.memory_space<vmem>>, %arg7: memref<1x4x2x128xf32, #tpu.memory_space<vmem>>) attributes {dimension_semantics = [#tpu.dimension_semantics<parallel>, #tpu.dimension_semantics<parallel>], iteration_bounds = array<i64: 2, 1>, scalar_prefetch = 4 : i64, scratch_operands = 0 : i64, tpu.core_type = #tpu.core_type<tc>, window_params = [{transform_indices = @transform_0, window_bounds = array<i64: 1, 4, 2, 128>}, {transform_indices = @transform_1, window_bounds = array<i64: 1, 4, 2, 128>}]} {
    %c1_i32 = arith.constant 1 : i32
    %0 = arith.muli %arg0, %c1_i32 : i32
    %1 = arith.addi %0, %arg1 : i32
    %c0 = arith.constant 0 : index
    %2 = memref.load %arg5[%c0] : memref<1xi32, #tpu.memory_space<smem>>
    %c0_0 = arith.constant 0 : index
    %c0_1 = arith.constant 0 : index
    %c0_2 = arith.constant 0 : index
    %c0_3 = arith.constant 0 : index
    %3 = vector.load %arg6[%c0_0, %c0_1, %c0_2, %c0_3] : memref<1x4x2x128xf32, #tpu.memory_space<vmem>>, vector<1x4x2x128xf32>
    %4 = vector.shape_cast %3 : vector<1x4x2x128xf32> to vector<4x2x128xf32>
    %c0_i32 = arith.constant 0 : i32
    %c7_i32 = arith.constant 7 : i32
    %5 = arith.addi %c0_i32, %c7_i32 : i32
    %c1_i32_4 = arith.constant 1 : i32
    %6 = scf.for %arg8 = %c0_i32 to %5 step %c1_i32_4 iter_args(%arg9 = %4) -> (vector<4x2x128xf32>)  : i32 {
      %c0_51 = arith.constant 0 : index
      %130 = arith.index_cast %arg8 : i32 to index
      %131 = memref.load %arg2[%c0_51, %130] : memref<3x8xf32, #tpu.memory_space<smem>>
      %c1_52 = arith.constant 1 : index
      %132 = arith.index_cast %arg8 : i32 to index
      %133 = memref.load %arg2[%c1_52, %132] : memref<3x8xf32, #tpu.memory_space<smem>>
      %c0_53 = arith.constant 0 : index
      %c0_54 = arith.constant 0 : index
      %134 = memref.load %arg4[%c0_53, %c0_54] : memref<4x4xf32, #tpu.memory_space<smem>>
      %135 = vector.extract_strided_slice %arg9 {offsets = [0, 0, 0], sizes = [1, 2, 128], strides = [1, 1, 1]} : vector<4x2x128xf32> to vector<1x2x128xf32>
      %136 = vector.shape_cast %135 : vector<1x2x128xf32> to vector<2x128xf32>
      %137 = vector.broadcast %134 : f32 to vector<2x128xf32>
      %138 = arith.mulf %137, %136 : vector<2x128xf32>
      %c0_55 = arith.constant 0 : index
      %c1_56 = arith.constant 1 : index
      %139 = memref.load %arg4[%c0_55, %c1_56] : memref<4x4xf32, #tpu.memory_space<smem>>
      %140 = vector.extract_strided_slice %arg9 {offsets = [1, 0, 0], sizes = [1, 2, 128], strides = [1, 1, 1]} : vector<4x2x128xf32> to vector<1x2x128xf32>
      %141 = vector.shape_cast %140 : vector<1x2x128xf32> to vector<2x128xf32>
      %142 = vector.broadcast %139 : f32 to vector<2x128xf32>
      %143 = arith.mulf %142, %141 : vector<2x128xf32>
      %144 = arith.addf %138, %143 : vector<2x128xf32>
      %c0_57 = arith.constant 0 : index
      %c2_58 = arith.constant 2 : index
      %145 = memref.load %arg4[%c0_57, %c2_58] : memref<4x4xf32, #tpu.memory_space<smem>>
      %146 = vector.extract_strided_slice %arg9 {offsets = [2, 0, 0], sizes = [1, 2, 128], strides = [1, 1, 1]} : vector<4x2x128xf32> to vector<1x2x128xf32>
      %147 = vector.shape_cast %146 : vector<1x2x128xf32> to vector<2x128xf32>
      %148 = vector.broadcast %145 : f32 to vector<2x128xf32>
      %149 = arith.mulf %148, %147 : vector<2x128xf32>
      %150 = arith.addf %144, %149 : vector<2x128xf32>
      %c0_59 = arith.constant 0 : index
      %c3_60 = arith.constant 3 : index
      %151 = memref.load %arg4[%c0_59, %c3_60] : memref<4x4xf32, #tpu.memory_space<smem>>
      %152 = vector.extract_strided_slice %arg9 {offsets = [3, 0, 0], sizes = [1, 2, 128], strides = [1, 1, 1]} : vector<4x2x128xf32> to vector<1x2x128xf32>
      %153 = vector.shape_cast %152 : vector<1x2x128xf32> to vector<2x128xf32>
      %154 = vector.broadcast %151 : f32 to vector<2x128xf32>
      %155 = arith.mulf %154, %153 : vector<2x128xf32>
      %156 = arith.addf %150, %155 : vector<2x128xf32>
      %c0_61 = arith.constant 0 : index
      %157 = arith.index_cast %arg8 : i32 to index
      %158 = memref.load %arg3[%c0_61, %157] : memref<4x8xf32, #tpu.memory_space<smem>>
      %159 = vector.broadcast %158 : f32 to vector<2x128xf32>
      %160 = arith.addf %156, %159 : vector<2x128xf32>
      %c1_62 = arith.constant 1 : index
      %c0_63 = arith.constant 0 : index
      %161 = memref.load %arg4[%c1_62, %c0_63] : memref<4x4xf32, #tpu.memory_space<smem>>
      %162 = vector.extract_strided_slice %arg9 {offsets = [0, 0, 0], sizes = [1, 2, 128], strides = [1, 1, 1]} : vector<4x2x128xf32> to vector<1x2x128xf32>
      %163 = vector.shape_cast %162 : vector<1x2x128xf32> to vector<2x128xf32>
      %164 = vector.broadcast %161 : f32 to vector<2x128xf32>
      %165 = arith.mulf %164, %163 : vector<2x128xf32>
      %c1_64 = arith.constant 1 : index
      %c1_65 = arith.constant 1 : index
      %166 = memref.load %arg4[%c1_64, %c1_65] : memref<4x4xf32, #tpu.memory_space<smem>>
      %167 = vector.extract_strided_slice %arg9 {offsets = [1, 0, 0], sizes = [1, 2, 128], strides = [1, 1, 1]} : vector<4x2x128xf32> to vector<1x2x128xf32>
      %168 = vector.shape_cast %167 : vector<1x2x128xf32> to vector<2x128xf32>
      %169 = vector.broadcast %166 : f32 to vector<2x128xf32>
      %170 = arith.mulf %169, %168 : vector<2x128xf32>
      %171 = arith.addf %165, %170 : vector<2x128xf32>
      %c1_66 = arith.constant 1 : index
      %c2_67 = arith.constant 2 : index
      %172 = memref.load %arg4[%c1_66, %c2_67] : memref<4x4xf32, #tpu.memory_space<smem>>
      %173 = vector.extract_strided_slice %arg9 {offsets = [2, 0, 0], sizes = [1, 2, 128], strides = [1, 1, 1]} : vector<4x2x128xf32> to vector<1x2x128xf32>
      %174 = vector.shape_cast %173 : vector<1x2x128xf32> to vector<2x128xf32>
      %175 = vector.broadcast %172 : f32 to vector<2x128xf32>
      %176 = arith.mulf %175, %174 : vector<2x128xf32>
      %177 = arith.addf %171, %176 : vector<2x128xf32>
      %c1_68 = arith.constant 1 : index
      %c3_69 = arith.constant 3 : index
      %178 = memref.load %arg4[%c1_68, %c3_69] : memref<4x4xf32, #tpu.memory_space<smem>>
      %179 = vector.extract_strided_slice %arg9 {offsets = [3, 0, 0], sizes = [1, 2, 128], strides = [1, 1, 1]} : vector<4x2x128xf32> to vector<1x2x128xf32>
      %180 = vector.shape_cast %179 : vector<1x2x128xf32> to vector<2x128xf32>
      %181 = vector.broadcast %178 : f32 to vector<2x128xf32>
      %182 = arith.mulf %181, %180 : vector<2x128xf32>
      %183 = arith.addf %177, %182 : vector<2x128xf32>
      %c1_70 = arith.constant 1 : index
      %184 = arith.index_cast %arg8 : i32 to index
      %185 = memref.load %arg3[%c1_70, %184] : memref<4x8xf32, #tpu.memory_space<smem>>
      %186 = vector.broadcast %185 : f32 to vector<2x128xf32>
      %187 = arith.addf %183, %186 : vector<2x128xf32>
      %c2_71 = arith.constant 2 : index
      %c0_72 = arith.constant 0 : index
      %188 = memref.load %arg4[%c2_71, %c0_72] : memref<4x4xf32, #tpu.memory_space<smem>>
      %189 = vector.extract_strided_slice %arg9 {offsets = [0, 0, 0], sizes = [1, 2, 128], strides = [1, 1, 1]} : vector<4x2x128xf32> to vector<1x2x128xf32>
      %190 = vector.shape_cast %189 : vector<1x2x128xf32> to vector<2x128xf32>
      %191 = vector.broadcast %188 : f32 to vector<2x128xf32>
      %192 = arith.mulf %191, %190 : vector<2x128xf32>
      %c2_73 = arith.constant 2 : index
      %c1_74 = arith.constant 1 : index
      %193 = memref.load %arg4[%c2_73, %c1_74] : memref<4x4xf32, #tpu.memory_space<smem>>
      %194 = vector.extract_strided_slice %arg9 {offsets = [1, 0, 0], sizes = [1, 2, 128], strides = [1, 1, 1]} : vector<4x2x128xf32> to vector<1x2x128xf32>
      %195 = vector.shape_cast %194 : vector<1x2x128xf32> to vector<2x128xf32>
      %196 = vector.broadcast %193 : f32 to vector<2x128xf32>
      %197 = arith.mulf %196, %195 : vector<2x128xf32>
      %198 = arith.addf %192, %197 : vector<2x128xf32>
      %c2_75 = arith.constant 2 : index
      %c2_76 = arith.constant 2 : index
      %199 = memref.load %arg4[%c2_75, %c2_76] : memref<4x4xf32, #tpu.memory_space<smem>>
      %200 = vector.extract_strided_slice %arg9 {offsets = [2, 0, 0], sizes = [1, 2, 128], strides = [1, 1, 1]} : vector<4x2x128xf32> to vector<1x2x128xf32>
      %201 = vector.shape_cast %200 : vector<1x2x128xf32> to vector<2x128xf32>
      %202 = vector.broadcast %199 : f32 to vector<2x128xf32>
      %203 = arith.mulf %202, %201 : vector<2x128xf32>
      %204 = arith.addf %198, %203 : vector<2x128xf32>
      %c2_77 = arith.constant 2 : index
      %c3_78 = arith.constant 3 : index
      %205 = memref.load %arg4[%c2_77, %c3_78] : memref<4x4xf32, #tpu.memory_space<smem>>
      %206 = vector.extract_strided_slice %arg9 {offsets = [3, 0, 0], sizes = [1, 2, 128], strides = [1, 1, 1]} : vector<4x2x128xf32> to vector<1x2x128xf32>
      %207 = vector.shape_cast %206 : vector<1x2x128xf32> to vector<2x128xf32>
      %208 = vector.broadcast %205 : f32 to vector<2x128xf32>
      %209 = arith.mulf %208, %207 : vector<2x128xf32>
      %210 = arith.addf %204, %209 : vector<2x128xf32>
      %c2_79 = arith.constant 2 : index
      %211 = arith.index_cast %arg8 : i32 to index
      %212 = memref.load %arg3[%c2_79, %211] : memref<4x8xf32, #tpu.memory_space<smem>>
      %213 = vector.broadcast %212 : f32 to vector<2x128xf32>
      %214 = arith.addf %210, %213 : vector<2x128xf32>
      %c3_80 = arith.constant 3 : index
      %c0_81 = arith.constant 0 : index
      %215 = memref.load %arg4[%c3_80, %c0_81] : memref<4x4xf32, #tpu.memory_space<smem>>
      %216 = vector.extract_strided_slice %arg9 {offsets = [0, 0, 0], sizes = [1, 2, 128], strides = [1, 1, 1]} : vector<4x2x128xf32> to vector<1x2x128xf32>
      %217 = vector.shape_cast %216 : vector<1x2x128xf32> to vector<2x128xf32>
      %218 = vector.broadcast %215 : f32 to vector<2x128xf32>
      %219 = arith.mulf %218, %217 : vector<2x128xf32>
      %c3_82 = arith.constant 3 : index
      %c1_83 = arith.constant 1 : index
      %220 = memref.load %arg4[%c3_82, %c1_83] : memref<4x4xf32, #tpu.memory_space<smem>>
      %221 = vector.extract_strided_slice %arg9 {offsets = [1, 0, 0], sizes = [1, 2, 128], strides = [1, 1, 1]} : vector<4x2x128xf32> to vector<1x2x128xf32>
      %222 = vector.shape_cast %221 : vector<1x2x128xf32> to vector<2x128xf32>
      %223 = vector.broadcast %220 : f32 to vector<2x128xf32>
      %224 = arith.mulf %223, %222 : vector<2x128xf32>
      %225 = arith.addf %219, %224 : vector<2x128xf32>
      %c3_84 = arith.constant 3 : index
      %c2_85 = arith.constant 2 : index
      %226 = memref.load %arg4[%c3_84, %c2_85] : memref<4x4xf32, #tpu.memory_space<smem>>
      %227 = vector.extract_strided_slice %arg9 {offsets = [2, 0, 0], sizes = [1, 2, 128], strides = [1, 1, 1]} : vector<4x2x128xf32> to vector<1x2x128xf32>
      %228 = vector.shape_cast %227 : vector<1x2x128xf32> to vector<2x128xf32>
      %229 = vector.broadcast %226 : f32 to vector<2x128xf32>
      %230 = arith.mulf %229, %228 : vector<2x128xf32>
      %231 = arith.addf %225, %230 : vector<2x128xf32>
      %c3_86 = arith.constant 3 : index
      %c3_87 = arith.constant 3 : index
      %232 = memref.load %arg4[%c3_86, %c3_87] : memref<4x4xf32, #tpu.memory_space<smem>>
      %233 = vector.extract_strided_slice %arg9 {offsets = [3, 0, 0], sizes = [1, 2, 128], strides = [1, 1, 1]} : vector<4x2x128xf32> to vector<1x2x128xf32>
      %234 = vector.shape_cast %233 : vector<1x2x128xf32> to vector<2x128xf32>
      %235 = vector.broadcast %232 : f32 to vector<2x128xf32>
      %236 = arith.mulf %235, %234 : vector<2x128xf32>
      %237 = arith.addf %231, %236 : vector<2x128xf32>
      %c3_88 = arith.constant 3 : index
      %238 = arith.index_cast %arg8 : i32 to index
      %239 = memref.load %arg3[%c3_88, %238] : memref<4x8xf32, #tpu.memory_space<smem>>
      %240 = vector.broadcast %239 : f32 to vector<2x128xf32>
      %241 = arith.addf %237, %240 : vector<2x128xf32>
      %242 = vector.shape_cast %160 : vector<2x128xf32> to vector<1x2x128xf32>
      %243 = vector.shape_cast %187 : vector<2x128xf32> to vector<1x2x128xf32>
      %244 = vector.shape_cast %214 : vector<2x128xf32> to vector<1x2x128xf32>
      %245 = vector.shape_cast %241 : vector<2x128xf32> to vector<1x2x128xf32>
      %246 = tpu.concatenate %242, %243, %244, %245 in 0 : vector<1x2x128xf32>, vector<1x2x128xf32>, vector<1x2x128xf32>, vector<1x2x128xf32> -> vector<4x2x128xf32>
      %247 = vector.broadcast %131 : f32 to vector<4x2x128xf32>
      %248 = arith.mulf %247, %arg9 : vector<4x2x128xf32>
      %249 = vector.broadcast %133 : f32 to vector<4x2x128xf32>
      %250 = arith.mulf %249, %246 : vector<4x2x128xf32>
      %251 = arith.subf %248, %250 : vector<4x2x128xf32>
      %c2_89 = arith.constant 2 : index
      %252 = arith.index_cast %arg8 : i32 to index
      %253 = memref.load %arg2[%c2_89, %252] : memref<3x8xf32, #tpu.memory_space<smem>>
      %c1000003_i32 = arith.constant 1000003 : i32
      %254 = arith.muli %arg8, %c1000003_i32 : i32
      %255 = arith.addi %2, %254 : i32
      %c7919_i32 = arith.constant 7919 : i32
      %256 = arith.muli %1, %c7919_i32 : i32
      %257 = arith.addi %255, %256 : i32
      %258 = tpu.iota {dimensions = array<i32: 0>} : vector<2x2x128xi32>
      %259 = tpu.iota {dimensions = array<i32: 1>} : vector<2x2x128xi32>
      %260 = tpu.iota {dimensions = array<i32: 2>} : vector<2x2x128xi32>
      %c2_i32 = arith.constant 2 : i32
      %261 = vector.broadcast %c2_i32 : i32 to vector<2x2x128xi32>
      %262 = arith.muli %258, %261 : vector<2x2x128xi32>
      %263 = arith.addi %262, %259 : vector<2x2x128xi32>
      %c128_i32 = arith.constant 128 : i32
      %264 = vector.broadcast %c128_i32 : i32 to vector<2x2x128xi32>
      %265 = arith.muli %263, %264 : vector<2x2x128xi32>
      %266 = arith.addi %265, %260 : vector<2x2x128xi32>
      %c-1640531527_i32 = arith.constant -1640531527 : i32
      %267 = vector.broadcast %c-1640531527_i32 : i32 to vector<2x2x128xi32>
      %268 = arith.muli %266, %267 : vector<2x2x128xi32>
      %269 = vector.broadcast %257 : i32 to vector<2x2x128xi32>
      %270 = arith.addi %268, %269 : vector<2x2x128xi32>
      %c0_i32_90 = arith.constant 0 : i32
      %271 = vector.broadcast %c0_i32_90 : i32 to vector<2x2x128xi32>
      %272 = arith.addi %270, %271 : vector<2x2x128xi32>
      %c16_i32 = arith.constant 16 : i32
      %273 = vector.broadcast %c16_i32 : i32 to vector<2x2x128xi32>
      %274 = arith.shrui %272, %273 : vector<2x2x128xi32>
      %275 = arith.xori %272, %274 : vector<2x2x128xi32>
      %c2146121005_i32 = arith.constant 2146121005 : i32
      %276 = vector.broadcast %c2146121005_i32 : i32 to vector<2x2x128xi32>
      %277 = arith.muli %275, %276 : vector<2x2x128xi32>
      %c15_i32 = arith.constant 15 : i32
      %278 = vector.broadcast %c15_i32 : i32 to vector<2x2x128xi32>
      %279 = arith.shrui %277, %278 : vector<2x2x128xi32>
      %280 = arith.xori %277, %279 : vector<2x2x128xi32>
      %c-2073254261_i32 = arith.constant -2073254261 : i32
      %281 = vector.broadcast %c-2073254261_i32 : i32 to vector<2x2x128xi32>
      %282 = arith.muli %280, %281 : vector<2x2x128xi32>
      %c16_i32_91 = arith.constant 16 : i32
      %283 = vector.broadcast %c16_i32_91 : i32 to vector<2x2x128xi32>
      %284 = arith.shrui %282, %283 : vector<2x2x128xi32>
      %285 = arith.xori %282, %284 : vector<2x2x128xi32>
      %286 = vector.broadcast %257 : i32 to vector<2x2x128xi32>
      %287 = arith.xori %285, %286 : vector<2x2x128xi32>
      %c16_i32_92 = arith.constant 16 : i32
      %288 = vector.broadcast %c16_i32_92 : i32 to vector<2x2x128xi32>
      %289 = arith.shrui %287, %288 : vector<2x2x128xi32>
      %290 = arith.xori %287, %289 : vector<2x2x128xi32>
      %c2146121005_i32_93 = arith.constant 2146121005 : i32
      %291 = vector.broadcast %c2146121005_i32_93 : i32 to vector<2x2x128xi32>
      %292 = arith.muli %290, %291 : vector<2x2x128xi32>
      %c15_i32_94 = arith.constant 15 : i32
      %293 = vector.broadcast %c15_i32_94 : i32 to vector<2x2x128xi32>
      %294 = arith.shrui %292, %293 : vector<2x2x128xi32>
      %295 = arith.xori %292, %294 : vector<2x2x128xi32>
      %c-2073254261_i32_95 = arith.constant -2073254261 : i32
      %296 = vector.broadcast %c-2073254261_i32_95 : i32 to vector<2x2x128xi32>
      %297 = arith.muli %295, %296 : vector<2x2x128xi32>
      %c16_i32_96 = arith.constant 16 : i32
      %298 = vector.broadcast %c16_i32_96 : i32 to vector<2x2x128xi32>
      %299 = arith.shrui %297, %298 : vector<2x2x128xi32>
      %300 = arith.xori %297, %299 : vector<2x2x128xi32>
      %c8_i32 = arith.constant 8 : i32
      %301 = vector.broadcast %c8_i32 : i32 to vector<2x2x128xi32>
      %302 = arith.shrui %300, %301 : vector<2x2x128xi32>
      %303 = arith.sitofp %302 : vector<2x2x128xi32> to vector<2x2x128xf32>
      %cst_97 = arith.constant 5.96046448E-8 : f32
      %304 = vector.broadcast %cst_97 : f32 to vector<2x2x128xf32>
      %305 = arith.mulf %303, %304 : vector<2x2x128xf32>
      %306 = tpu.iota {dimensions = array<i32: 0>} : vector<2x2x128xi32>
      %307 = tpu.iota {dimensions = array<i32: 1>} : vector<2x2x128xi32>
      %308 = tpu.iota {dimensions = array<i32: 2>} : vector<2x2x128xi32>
      %c2_i32_98 = arith.constant 2 : i32
      %309 = vector.broadcast %c2_i32_98 : i32 to vector<2x2x128xi32>
      %310 = arith.muli %306, %309 : vector<2x2x128xi32>
      %311 = arith.addi %310, %307 : vector<2x2x128xi32>
      %c128_i32_99 = arith.constant 128 : i32
      %312 = vector.broadcast %c128_i32_99 : i32 to vector<2x2x128xi32>
      %313 = arith.muli %311, %312 : vector<2x2x128xi32>
      %314 = arith.addi %313, %308 : vector<2x2x128xi32>
      %c-1640531527_i32_100 = arith.constant -1640531527 : i32
      %315 = vector.broadcast %c-1640531527_i32_100 : i32 to vector<2x2x128xi32>
      %316 = arith.muli %314, %315 : vector<2x2x128xi32>
      %317 = vector.broadcast %257 : i32 to vector<2x2x128xi32>
      %318 = arith.addi %316, %317 : vector<2x2x128xi32>
      %c-2048144789_i32 = arith.constant -2048144789 : i32
      %319 = vector.broadcast %c-2048144789_i32 : i32 to vector<2x2x128xi32>
      %320 = arith.addi %318, %319 : vector<2x2x128xi32>
      %c16_i32_101 = arith.constant 16 : i32
      %321 = vector.broadcast %c16_i32_101 : i32 to vector<2x2x128xi32>
      %322 = arith.shrui %320, %321 : vector<2x2x128xi32>
      %323 = arith.xori %320, %322 : vector<2x2x128xi32>
      %c2146121005_i32_102 = arith.constant 2146121005 : i32
      %324 = vector.broadcast %c2146121005_i32_102 : i32 to vector<2x2x128xi32>
      %325 = arith.muli %323, %324 : vector<2x2x128xi32>
      %c15_i32_103 = arith.constant 15 : i32
      %326 = vector.broadcast %c15_i32_103 : i32 to vector<2x2x128xi32>
      %327 = arith.shrui %325, %326 : vector<2x2x128xi32>
      %328 = arith.xori %325, %327 : vector<2x2x128xi32>
      %c-2073254261_i32_104 = arith.constant -2073254261 : i32
      %329 = vector.broadcast %c-2073254261_i32_104 : i32 to vector<2x2x128xi32>
      %330 = arith.muli %328, %329 : vector<2x2x128xi32>
      %c16_i32_105 = arith.constant 16 : i32
      %331 = vector.broadcast %c16_i32_105 : i32 to vector<2x2x128xi32>
      %332 = arith.shrui %330, %331 : vector<2x2x128xi32>
      %333 = arith.xori %330, %332 : vector<2x2x128xi32>
      %334 = vector.broadcast %257 : i32 to vector<2x2x128xi32>
      %335 = arith.xori %333, %334 : vector<2x2x128xi32>
      %c16_i32_106 = arith.constant 16 : i32
      %336 = vector.broadcast %c16_i32_106 : i32 to vector<2x2x128xi32>
      %337 = arith.shrui %335, %336 : vector<2x2x128xi32>
      %338 = arith.xori %335, %337 : vector<2x2x128xi32>
      %c2146121005_i32_107 = arith.constant 2146121005 : i32
      %339 = vector.broadcast %c2146121005_i32_107 : i32 to vector<2x2x128xi32>
      %340 = arith.muli %338, %339 : vector<2x2x128xi32>
      %c15_i32_108 = arith.constant 15 : i32
      %341 = vector.broadcast %c15_i32_108 : i32 to vector<2x2x128xi32>
      %342 = arith.shrui %340, %341 : vector<2x2x128xi32>
      %343 = arith.xori %340, %342 : vector<2x2x128xi32>
      %c-2073254261_i32_109 = arith.constant -2073254261 : i32
      %344 = vector.broadcast %c-2073254261_i32_109 : i32 to vector<2x2x128xi32>
      %345 = arith.muli %343, %344 : vector<2x2x128xi32>
      %c16_i32_110 = arith.constant 16 : i32
      %346 = vector.broadcast %c16_i32_110 : i32 to vector<2x2x128xi32>
      %347 = arith.shrui %345, %346 : vector<2x2x128xi32>
      %348 = arith.xori %345, %347 : vector<2x2x128xi32>
      %c8_i32_111 = arith.constant 8 : i32
      %349 = vector.broadcast %c8_i32_111 : i32 to vector<2x2x128xi32>
      %350 = arith.shrui %348, %349 : vector<2x2x128xi32>
      %351 = arith.sitofp %350 : vector<2x2x128xi32> to vector<2x2x128xf32>
      %cst_112 = arith.constant 5.96046448E-8 : f32
      %352 = vector.broadcast %cst_112 : f32 to vector<2x2x128xf32>
      %353 = arith.mulf %351, %352 : vector<2x2x128xf32>
      %cst_113 = arith.constant 1.000000e+00 : f32
      %354 = vector.broadcast %cst_113 : f32 to vector<2x2x128xf32>
      %355 = arith.subf %354, %305 : vector<2x2x128xf32>
      %356 = math.log %355 : vector<2x2x128xf32>
      %cst_114 = arith.constant -2.000000e+00 : f32
      %357 = vector.broadcast %cst_114 : f32 to vector<2x2x128xf32>
      %358 = arith.mulf %357, %356 : vector<2x2x128xf32>
      %359 = math.sqrt %358 : vector<2x2x128xf32>
      %cst_115 = arith.constant 6.28318548 : f32
      %360 = vector.broadcast %cst_115 : f32 to vector<2x2x128xf32>
      %361 = arith.mulf %360, %353 : vector<2x2x128xf32>
      %362 = math.cos %361 : vector<2x2x128xf32>
      %363 = arith.mulf %359, %362 : vector<2x2x128xf32>
      %364 = math.sin %361 : vector<2x2x128xf32>
      %365 = arith.mulf %359, %364 : vector<2x2x128xf32>
      %366 = tpu.concatenate %363, %365 in 0 : vector<2x2x128xf32>, vector<2x2x128xf32> -> vector<4x2x128xf32>
      %367 = vector.broadcast %253 : f32 to vector<4x2x128xf32>
      %368 = arith.mulf %367, %366 : vector<4x2x128xf32>
      %369 = arith.addf %251, %368 : vector<4x2x128xf32>
      scf.yield %369 : vector<4x2x128xf32>
    }
    %c7_i32_5 = arith.constant 7 : i32
    %c0_6 = arith.constant 0 : index
    %c7 = arith.constant 7 : index
    %7 = memref.load %arg2[%c0_6, %c7] : memref<3x8xf32, #tpu.memory_space<smem>>
    %c1 = arith.constant 1 : index
    %c7_7 = arith.constant 7 : index
    %8 = memref.load %arg2[%c1, %c7_7] : memref<3x8xf32, #tpu.memory_space<smem>>
    %c0_8 = arith.constant 0 : index
    %c0_9 = arith.constant 0 : index
    %9 = memref.load %arg4[%c0_8, %c0_9] : memref<4x4xf32, #tpu.memory_space<smem>>
    %10 = vector.extract_strided_slice %6 {offsets = [0, 0, 0], sizes = [1, 2, 128], strides = [1, 1, 1]} : vector<4x2x128xf32> to vector<1x2x128xf32>
    %11 = vector.shape_cast %10 : vector<1x2x128xf32> to vector<2x128xf32>
    %12 = vector.broadcast %9 : f32 to vector<2x128xf32>
    %13 = arith.mulf %12, %11 : vector<2x128xf32>
    %c0_10 = arith.constant 0 : index
    %c1_11 = arith.constant 1 : index
    %14 = memref.load %arg4[%c0_10, %c1_11] : memref<4x4xf32, #tpu.memory_space<smem>>
    %15 = vector.extract_strided_slice %6 {offsets = [1, 0, 0], sizes = [1, 2, 128], strides = [1, 1, 1]} : vector<4x2x128xf32> to vector<1x2x128xf32>
    %16 = vector.shape_cast %15 : vector<1x2x128xf32> to vector<2x128xf32>
    %17 = vector.broadcast %14 : f32 to vector<2x128xf32>
    %18 = arith.mulf %17, %16 : vector<2x128xf32>
    %19 = arith.addf %13, %18 : vector<2x128xf32>
    %c0_12 = arith.constant 0 : index
    %c2 = arith.constant 2 : index
    %20 = memref.load %arg4[%c0_12, %c2] : memref<4x4xf32, #tpu.memory_space<smem>>
    %21 = vector.extract_strided_slice %6 {offsets = [2, 0, 0], sizes = [1, 2, 128], strides = [1, 1, 1]} : vector<4x2x128xf32> to vector<1x2x128xf32>
    %22 = vector.shape_cast %21 : vector<1x2x128xf32> to vector<2x128xf32>
    %23 = vector.broadcast %20 : f32 to vector<2x128xf32>
    %24 = arith.mulf %23, %22 : vector<2x128xf32>
    %25 = arith.addf %19, %24 : vector<2x128xf32>
    %c0_13 = arith.constant 0 : index
    %c3 = arith.constant 3 : index
    %26 = memref.load %arg4[%c0_13, %c3] : memref<4x4xf32, #tpu.memory_space<smem>>
    %27 = vector.extract_strided_slice %6 {offsets = [3, 0, 0], sizes = [1, 2, 128], strides = [1, 1, 1]} : vector<4x2x128xf32> to vector<1x2x128xf32>
    %28 = vector.shape_cast %27 : vector<1x2x128xf32> to vector<2x128xf32>
    %29 = vector.broadcast %26 : f32 to vector<2x128xf32>
    %30 = arith.mulf %29, %28 : vector<2x128xf32>
    %31 = arith.addf %25, %30 : vector<2x128xf32>
    %c0_14 = arith.constant 0 : index
    %c7_15 = arith.constant 7 : index
    %32 = memref.load %arg3[%c0_14, %c7_15] : memref<4x8xf32, #tpu.memory_space<smem>>
    %33 = vector.broadcast %32 : f32 to vector<2x128xf32>
    %34 = arith.addf %31, %33 : vector<2x128xf32>
    %c1_16 = arith.constant 1 : index
    %c0_17 = arith.constant 0 : index
    %35 = memref.load %arg4[%c1_16, %c0_17] : memref<4x4xf32, #tpu.memory_space<smem>>
    %36 = vector.extract_strided_slice %6 {offsets = [0, 0, 0], sizes = [1, 2, 128], strides = [1, 1, 1]} : vector<4x2x128xf32> to vector<1x2x128xf32>
    %37 = vector.shape_cast %36 : vector<1x2x128xf32> to vector<2x128xf32>
    %38 = vector.broadcast %35 : f32 to vector<2x128xf32>
    %39 = arith.mulf %38, %37 : vector<2x128xf32>
    %c1_18 = arith.constant 1 : index
    %c1_19 = arith.constant 1 : index
    %40 = memref.load %arg4[%c1_18, %c1_19] : memref<4x4xf32, #tpu.memory_space<smem>>
    %41 = vector.extract_strided_slice %6 {offsets = [1, 0, 0], sizes = [1, 2, 128], strides = [1, 1, 1]} : vector<4x2x128xf32> to vector<1x2x128xf32>
    %42 = vector.shape_cast %41 : vector<1x2x128xf32> to vector<2x128xf32>
    %43 = vector.broadcast %40 : f32 to vector<2x128xf32>
    %44 = arith.mulf %43, %42 : vector<2x128xf32>
    %45 = arith.addf %39, %44 : vector<2x128xf32>
    %c1_20 = arith.constant 1 : index
    %c2_21 = arith.constant 2 : index
    %46 = memref.load %arg4[%c1_20, %c2_21] : memref<4x4xf32, #tpu.memory_space<smem>>
    %47 = vector.extract_strided_slice %6 {offsets = [2, 0, 0], sizes = [1, 2, 128], strides = [1, 1, 1]} : vector<4x2x128xf32> to vector<1x2x128xf32>
    %48 = vector.shape_cast %47 : vector<1x2x128xf32> to vector<2x128xf32>
    %49 = vector.broadcast %46 : f32 to vector<2x128xf32>
    %50 = arith.mulf %49, %48 : vector<2x128xf32>
    %51 = arith.addf %45, %50 : vector<2x128xf32>
    %c1_22 = arith.constant 1 : index
    %c3_23 = arith.constant 3 : index
    %52 = memref.load %arg4[%c1_22, %c3_23] : memref<4x4xf32, #tpu.memory_space<smem>>
    %53 = vector.extract_strided_slice %6 {offsets = [3, 0, 0], sizes = [1, 2, 128], strides = [1, 1, 1]} : vector<4x2x128xf32> to vector<1x2x128xf32>
    %54 = vector.shape_cast %53 : vector<1x2x128xf32> to vector<2x128xf32>
    %55 = vector.broadcast %52 : f32 to vector<2x128xf32>
    %56 = arith.mulf %55, %54 : vector<2x128xf32>
    %57 = arith.addf %51, %56 : vector<2x128xf32>
    %c1_24 = arith.constant 1 : index
    %c7_25 = arith.constant 7 : index
    %58 = memref.load %arg3[%c1_24, %c7_25] : memref<4x8xf32, #tpu.memory_space<smem>>
    %59 = vector.broadcast %58 : f32 to vector<2x128xf32>
    %60 = arith.addf %57, %59 : vector<2x128xf32>
    %c2_26 = arith.constant 2 : index
    %c0_27 = arith.constant 0 : index
    %61 = memref.load %arg4[%c2_26, %c0_27] : memref<4x4xf32, #tpu.memory_space<smem>>
    %62 = vector.extract_strided_slice %6 {offsets = [0, 0, 0], sizes = [1, 2, 128], strides = [1, 1, 1]} : vector<4x2x128xf32> to vector<1x2x128xf32>
    %63 = vector.shape_cast %62 : vector<1x2x128xf32> to vector<2x128xf32>
    %64 = vector.broadcast %61 : f32 to vector<2x128xf32>
    %65 = arith.mulf %64, %63 : vector<2x128xf32>
    %c2_28 = arith.constant 2 : index
    %c1_29 = arith.constant 1 : index
    %66 = memref.load %arg4[%c2_28, %c1_29] : memref<4x4xf32, #tpu.memory_space<smem>>
    %67 = vector.extract_strided_slice %6 {offsets = [1, 0, 0], sizes = [1, 2, 128], strides = [1, 1, 1]} : vector<4x2x128xf32> to vector<1x2x128xf32>
    %68 = vector.shape_cast %67 : vector<1x2x128xf32> to vector<2x128xf32>
    %69 = vector.broadcast %66 : f32 to vector<2x128xf32>
    %70 = arith.mulf %69, %68 : vector<2x128xf32>
    %71 = arith.addf %65, %70 : vector<2x128xf32>
    %c2_30 = arith.constant 2 : index
    %c2_31 = arith.constant 2 : index
    %72 = memref.load %arg4[%c2_30, %c2_31] : memref<4x4xf32, #tpu.memory_space<smem>>
    %73 = vector.extract_strided_slice %6 {offsets = [2, 0, 0], sizes = [1, 2, 128], strides = [1, 1, 1]} : vector<4x2x128xf32> to vector<1x2x128xf32>
    %74 = vector.shape_cast %73 : vector<1x2x128xf32> to vector<2x128xf32>
    %75 = vector.broadcast %72 : f32 to vector<2x128xf32>
    %76 = arith.mulf %75, %74 : vector<2x128xf32>
    %77 = arith.addf %71, %76 : vector<2x128xf32>
    %c2_32 = arith.constant 2 : index
    %c3_33 = arith.constant 3 : index
    %78 = memref.load %arg4[%c2_32, %c3_33] : memref<4x4xf32, #tpu.memory_space<smem>>
    %79 = vector.extract_strided_slice %6 {offsets = [3, 0, 0], sizes = [1, 2, 128], strides = [1, 1, 1]} : vector<4x2x128xf32> to vector<1x2x128xf32>
    %80 = vector.shape_cast %79 : vector<1x2x128xf32> to vector<2x128xf32>
    %81 = vector.broadcast %78 : f32 to vector<2x128xf32>
    %82 = arith.mulf %81, %80 : vector<2x128xf32>
    %83 = arith.addf %77, %82 : vector<2x128xf32>
    %c2_34 = arith.constant 2 : index
    %c7_35 = arith.constant 7 : index
    %84 = memref.load %arg3[%c2_34, %c7_35] : memref<4x8xf32, #tpu.memory_space<smem>>
    %85 = vector.broadcast %84 : f32 to vector<2x128xf32>
    %86 = arith.addf %83, %85 : vector<2x128xf32>
    %c3_36 = arith.constant 3 : index
    %c0_37 = arith.constant 0 : index
    %87 = memref.load %arg4[%c3_36, %c0_37] : memref<4x4xf32, #tpu.memory_space<smem>>
    %88 = vector.extract_strided_slice %6 {offsets = [0, 0, 0], sizes = [1, 2, 128], strides = [1, 1, 1]} : vector<4x2x128xf32> to vector<1x2x128xf32>
    %89 = vector.shape_cast %88 : vector<1x2x128xf32> to vector<2x128xf32>
    %90 = vector.broadcast %87 : f32 to vector<2x128xf32>
    %91 = arith.mulf %90, %89 : vector<2x128xf32>
    %c3_38 = arith.constant 3 : index
    %c1_39 = arith.constant 1 : index
    %92 = memref.load %arg4[%c3_38, %c1_39] : memref<4x4xf32, #tpu.memory_space<smem>>
    %93 = vector.extract_strided_slice %6 {offsets = [1, 0, 0], sizes = [1, 2, 128], strides = [1, 1, 1]} : vector<4x2x128xf32> to vector<1x2x128xf32>
    %94 = vector.shape_cast %93 : vector<1x2x128xf32> to vector<2x128xf32>
    %95 = vector.broadcast %92 : f32 to vector<2x128xf32>
    %96 = arith.mulf %95, %94 : vector<2x128xf32>
    %97 = arith.addf %91, %96 : vector<2x128xf32>
    %c3_40 = arith.constant 3 : index
    %c2_41 = arith.constant 2 : index
    %98 = memref.load %arg4[%c3_40, %c2_41] : memref<4x4xf32, #tpu.memory_space<smem>>
    %99 = vector.extract_strided_slice %6 {offsets = [2, 0, 0], sizes = [1, 2, 128], strides = [1, 1, 1]} : vector<4x2x128xf32> to vector<1x2x128xf32>
    %100 = vector.shape_cast %99 : vector<1x2x128xf32> to vector<2x128xf32>
    %101 = vector.broadcast %98 : f32 to vector<2x128xf32>
    %102 = arith.mulf %101, %100 : vector<2x128xf32>
    %103 = arith.addf %97, %102 : vector<2x128xf32>
    %c3_42 = arith.constant 3 : index
    %c3_43 = arith.constant 3 : index
    %104 = memref.load %arg4[%c3_42, %c3_43] : memref<4x4xf32, #tpu.memory_space<smem>>
    %105 = vector.extract_strided_slice %6 {offsets = [3, 0, 0], sizes = [1, 2, 128], strides = [1, 1, 1]} : vector<4x2x128xf32> to vector<1x2x128xf32>
    %106 = vector.shape_cast %105 : vector<1x2x128xf32> to vector<2x128xf32>
    %107 = vector.broadcast %104 : f32 to vector<2x128xf32>
    %108 = arith.mulf %107, %106 : vector<2x128xf32>
    %109 = arith.addf %103, %108 : vector<2x128xf32>
    %c3_44 = arith.constant 3 : index
    %c7_45 = arith.constant 7 : index
    %110 = memref.load %arg3[%c3_44, %c7_45] : memref<4x8xf32, #tpu.memory_space<smem>>
    %111 = vector.broadcast %110 : f32 to vector<2x128xf32>
    %112 = arith.addf %109, %111 : vector<2x128xf32>
    %113 = vector.shape_cast %34 : vector<2x128xf32> to vector<1x2x128xf32>
    %114 = vector.shape_cast %60 : vector<2x128xf32> to vector<1x2x128xf32>
    %115 = vector.shape_cast %86 : vector<2x128xf32> to vector<1x2x128xf32>
    %116 = vector.shape_cast %112 : vector<2x128xf32> to vector<1x2x128xf32>
    %117 = tpu.concatenate %113, %114, %115, %116 in 0 : vector<1x2x128xf32>, vector<1x2x128xf32>, vector<1x2x128xf32>, vector<1x2x128xf32> -> vector<4x2x128xf32>
    %118 = vector.broadcast %7 : f32 to vector<4x2x128xf32>
    %119 = arith.mulf %118, %6 : vector<4x2x128xf32>
    %120 = vector.broadcast %8 : f32 to vector<4x2x128xf32>
    %121 = arith.mulf %120, %117 : vector<4x2x128xf32>
    %122 = arith.subf %119, %121 : vector<4x2x128xf32>
    %cst = arith.constant -1.000000e+00 : f32
    %cst_46 = arith.constant 1.000000e+00 : f32
    %123 = vector.broadcast %cst : f32 to vector<4x2x128xf32>
    %124 = arith.maximumf %123, %122 : vector<4x2x128xf32>
    %125 = vector.broadcast %cst_46 : f32 to vector<4x2x128xf32>
    %126 = arith.minimumf %125, %124 : vector<4x2x128xf32>
    %c0_47 = arith.constant 0 : index
    %c0_48 = arith.constant 0 : index
    %c0_49 = arith.constant 0 : index
    %c0_50 = arith.constant 0 : index
    %127 = vector.load %arg7[%c0_47, %c0_48, %c0_49, %c0_50] : memref<1x4x2x128xf32, #tpu.memory_space<vmem>>, vector<1x4x2x128xf32>
    %128 = vector.shape_cast %127 : vector<1x4x2x128xf32> to vector<4x2x128xf32>
    %129 = vector.shape_cast %126 : vector<4x2x128xf32> to vector<1x4x2x128xf32>
    tpu.vector_store %arg7[%c0_47, %c0_48, %c0_49, %c0_50], %129 {strides = array<i32>} : memref<1x4x2x128xf32, #tpu.memory_space<vmem>>, vector<1x4x2x128xf32>,
    return
  }
  func.func @transform_0(%arg0: i32, %arg1: i32, %arg2: memref<3x8xf32, #tpu.memory_space<smem>>, %arg3: memref<4x8xf32, #tpu.memory_space<smem>>, %arg4: memref<4x4xf32, #tpu.memory_space<smem>>, %arg5: memref<1xi32, #tpu.memory_space<smem>>) -> (i32, i32, i32, i32) {
    %c0_i32 = arith.constant 0 : i32
    %c0_i32_0 = arith.constant 0 : i32
    %c0_i32_1 = arith.constant 0 : i32
    return %arg0, %c0_i32, %arg1, %c0_i32_0 : i32, i32, i32, i32
  }
  func.func @transform_1(%arg0: i32, %arg1: i32, %arg2: memref<3x8xf32, #tpu.memory_space<smem>>, %arg3: memref<4x8xf32, #tpu.memory_space<smem>>, %arg4: memref<4x4xf32, #tpu.memory_space<smem>>, %arg5: memref<1xi32, #tpu.memory_space<smem>>) -> (i32, i32, i32, i32) {
    %c0_i32 = arith.constant 0 : i32
    %c0_i32_0 = arith.constant 0 : i32
    %c0_i32_1 = arith.constant 0 : i32
    return %arg0, %c0_i32, %arg1, %c0_i32_0 : i32, i32, i32, i32
  }
}

</mosaic_0001>

<bundles_post_ra>
// kernel: _sample_fused.1
= control target key start
LH: loop header
LB: loop body
LE: loop exit
PB: predicated region body
PF: predicated region fallthrough
CT: control target
= control target key end

     0   :  { %s1512_s24 = smov [#allocation3]   ;;  %s1513_s25 = smov [#allocation4]   ;;  %s2088_s0 = inlined_call_operand.vmem [shape: f32[3,8], index: 0, kind: input, shape index: {}]   ;;  %s2089_s4 = inlined_call_operand.vmem [shape: f32[2,4,2,128], index: 4, kind: input, shape index: {}]   ;;  %s2090_s5 = inlined_call_operand.vmem [shape: f32[2,4,2,128], index: 5, kind: output, shape index: {}]   ;;  %s2091_s1 = inlined_call_operand.vmem [shape: f32[4,8], index: 1, kind: input, shape index: {}]   ;;  %s2092_s2 = inlined_call_operand.vmem [shape: f32[4,4], index: 2, kind: input, shape index: {}]   ;;  %s2093_s3 = inlined_call_operand.<no memory space> [shape: s32[1], index: 3, kind: input, shape index: {}]  }
   0x1   :  { %s11_s20 = sshll.u32 %s2088_s0, 4  ;;  %s16_s23 = sshll.u32 %s2091_s1, 4  ;;  %s12_s20 = int_to_ptr.vmem [resolvable:$true] %s11_s20  ;;  %s17_s23 = int_to_ptr.vmem [resolvable:$true] %s16_s23 }
   0x2   :  { %14 = dma.vmem_to_smem %s12_s20, 64, %s1512_s24, [#allocation2] }
   0x3   :  { %19 = dma.vmem_to_smem %s17_s23, 64, %s1513_s25, [#allocation2] }
   0x4   :  { %s21_s28 = sshll.u32 %s2092_s2, 4  ;;  %25 = sst [smem:[#allocation6]] %s2093_s3  ;;  %s22_s28 = int_to_ptr.vmem [resolvable:$true] %s21_s28 }
   0x5   :  { %s1514_s0 = smov [#allocation5]  }
   0x6   :  { %24 = dma.vmem_to_smem %s22_s28, 64, %s1514_s0, [#allocation2] }
   0x7   :  { %1478 = dma.done.wait [#allocation2], 192 }
   0x8   :  { %1479 = vsyncadd [#allocation2], 4294967104 }
   0x9   :  { %28 = sfence }
   0xa   :  { %s1564_s1 = smov 0   ;;  %s1566_s6 = smov 0  }
   0xb   :  { %s1568_s7 = smov 0  }
   0xc LB: > { %s46_s2 = sadd.s32 1, %s1486_s6  ;;  %p1258_p0 = scmp.ge.s32.totalorder %s1490_s7, 1  ;;  %s1490_s7 = sphi %s1568_s7, %s34_s7   ;;  %s1486_s6 = sphi %s1566_s6, %s2107_s6   ;;  %s1482_s1 = sphi %s1564_s1, %s2106_s1  }
   0xd   : > { %p48_p1 = scmp.ge.s32.totalorder %s46_s2, 2  ;;  %p129_p2 = scmp.lt.s32.totalorder %s1490_s7, 3 }
   0xf   : > { %s2109_s2 = smov (%p48_p1, %s46_s2), 0  ;;  %p130_p3 = pnand %p1258_p0, %p129_p2 }
  0x10   : > { %p155_p4 = scmp.lt.s32.totalorder (!%p130_p3), %s1482_s1, 1  ;;  %s1585_s3 = sld [smem:[#allocation6]] (!%p130_p3) }
  0x11   : > { %133 = sbr.rel (%p130_p3) target bundleno = 228 (0xe4), region = 24  ;;  %s1604_s16 = smov (!%p130_p3), 0  }
  0x16   : > { %s156_s8 = scalar_select %p155_p4, %s1482_s1, 1 }
  0x18   : > { %s1320_s9 = sshll.u32 %s156_s8, 3 }
  0x19   : > { %s162_s12 = scalar_lea.vmem %s2089_s4, %s1320_s9  ;;  %s1594_s15 = scalar_lea.vmem %s2090_s5, %s1320_s9 }
  0x1a   : > { %v173_v0 = vld [vmem:[%s162_s12] sm:$0x3]   ;;  %v174_v1 = vld [vmem:[%s162_s12 + $0x2] sm:$0x3]   ;;  %v175_v2 = vld [vmem:[%s162_s12 + $0x4] sm:$0x3]  }
  0x1b   : > { %v176_v3 = vld [vmem:[%s162_s12 + $0x6] sm:$0x3]  }
  0x1c LB: >> { %v293_v4 = vlaneseq  ;;  %s289_s17 = smul.u32 1000003, %s1510_s16  ;;  %s1691_s21 = sld [smem:[#allocation5]]  ;;  %s1510_s16 = sphi %s1604_s16, %s182_s16   ;;  %v1506_v0 = vphi %v173_v0, %v2105_v0   ;;  %v1502_v1 = vphi %v174_v1, %v2104_v1   ;;  %v1498_v2 = vphi %v175_v2, %v2103_v2   ;;  %v1494_v3 = vphi %v176_v3, %v2102_v3  }
  0x1d   : >> { %s291_s18 = smul.u32 7919, %s1482_s1  ;;  %s1708_s22 = sld [smem:[#allocation5 + $0x1]] }
  0x1e   : >> { %v294_v5 = vshrl.u32 %v293_v4, 7  ;;  %v296_v6 = vand.u32 127, %v293_v4  ;;  %s290_s19 = sadd.s32 %s289_s17, %s1585_s3  ;;  %s1756_s23 = sld [smem:[#allocation5 + $0x2]] }
  0x1f   : >> { %s292_s20 = sadd.s32 %s291_s18, %s290_s19  ;;  %s1770_s24 = sld [smem:[#allocation5 + $0x3]] }
  0x20   : >> { %v297_v7 = vadd.s32 2, %v294_v5  ;;  %v298_v8 = vmul.u32 128, %v294_v5  ;;  %v304_v14 = vstv %s292_s20  ;;  %s188_s25 = sshra.s32 %s1510_s16, 7  ;;  %s1790_s27 = sld [smem:[#allocation3 + %s1510_s16]] }
  0x21   : >> { %s1780_s26 = sshll.u32 %s188_s25, 7  ;;  %s1793_s28 = sand.u32 127, %s1510_s16 }
  0x22   : >> { %v299_v9 = vmul.u32 128, %v297_v7  ;;  %v300_v10 = vadd.s32 %v298_v8, %v296_v6  ;;  %s1323_s29 = sadd.s32 128, %s1780_s26  ;;  %s1802_s30 = sld [smem:[#allocation4 + %s1510_s16]] }
  0x23   : >> { %s1808_s0 = sld [smem:[#allocation5 + $0x80]]  ;;  %s1816_s9 = sadd.s32 %s1323_s29, %s1793_s28 }
  0x24   : >> { %v301_v11 = vadd.s32 %v299_v9, %v296_v6  ;;  %v302_v12 = vmul.u32 2654435769, %v300_v10  ;;  %s1810_s8 = sld [smem:[#allocation5 + $0x100]]  ;;  %s1325_s19 = sadd.s32 256, %s1780_s26 }
  0x25   : >> { %s1818_s10 = sld [smem:[#allocation5 + $0x101]]  ;;  %s1327_s29 = sadd.s32 384, %s1780_s26 }
  0x26   : >> { %v303_v13 = vmul.u32 2654435769, %v301_v11  ;;  %v305_v15 = vadd.s32 %v304_v14, %v302_v12  ;;  %s1823_s11 = sld [smem:[#allocation3 + %s1816_s9]]  ;;  %s270_s26 = sadd.s32 %s1327_s29, %s1793_s28 }
  0x27   : >> { %s1829_s12 = sld [smem:[#allocation5 + $0x81]]  ;;  %s182_s16 = sadd.s32 1, %s1510_s16  }
  0x28   : >> { %v306_v16 = vadd.s32 %v304_v14, %v303_v13  ;;  %v307_v17 = vshrl.u32 %v305_v15, 16  ;;  %v347_v26 = vadd.s32 2246822507, %v305_v15  ;;  %s1831_s13 = sld [smem:[#allocation5 + $0x102]]  ;;  %p179_p5 = scmp.ge.s32.totalorder %s182_s16, 7  }
  0x29   : >> { %s1840_s14 = sld [smem:[#allocation5 + $0x82]] }
  0x2a   : >> { %v308_v18 = vshrl.u32 %v306_v16, 16  ;;  %v309_v19 = vxor.u32 %v307_v17, %v305_v15  ;;  %v348_v28 = vadd.s32 2246822507, %v306_v16  ;;  %v349_v32 = vshrl.u32 %v347_v26, 16  ;;  %s1843_s17 = sld [smem:[#allocation5 + $0x103]] }
  0x2b   : >> { %s1856_s18 = sld [smem:[#allocation5 + $0x83]] }
  0x2c   : >> { %v310_v20 = vxor.u32 %v308_v18, %v306_v16  ;;  %v311_v21 = vmul.u32 2146121005, %v309_v19  ;;  %v350_v33 = vshrl.u32 %v348_v28, 16  ;;  %v351_v36 = vxor.u32 %v349_v32, %v347_v26  ;;  %s1867_s20 = sld [smem:[#allocation5 + $0x180]] }
  0x2d   : > { %s1302_s1 = sld [smem:[#allocation5 + $0x83]] (%p179_p5) }
  0x2e   : >> { %v312_v22 = vmul.u32 2146121005, %v310_v20  ;;  %v313_v23 = vshrl.u32 %v311_v21, 15  ;;  %v352_v37 = vxor.u32 %v350_v33, %v348_v28  ;;  %v353_v40 = vmul.u32 2146121005, %v351_v36  ;;  %s2050_s3 = sld [smem:[#allocation4 + $0x87]] (%p179_p5) }
  0x2f   : > { %s1304_s16 = sld [smem:[#allocation5 + $0x100]] (%p179_p5) }
  0x30   : >> { %v314_v24 = vshrl.u32 %v312_v22, 15  ;;  %v315_v25 = vxor.u32 %v313_v23, %v311_v21  ;;  %v354_v41 = vmul.u32 2146121005, %v352_v37  ;;  %v355_v43 = vshrl.u32 %v353_v40, 15  ;;  %s1313_s29 = sld [smem:[#allocation4 + $0x187]] (%p179_p5) }
  0x32   : >> { %v316_v27 = vxor.u32 %v314_v24, %v312_v22  ;;  %v317_v29 = vmul.u32 2221713035, %v315_v25  ;;  %v356_v44 = vshrl.u32 %v354_v41, 15  ;;  %v357_v45 = vxor.u32 %v355_v43, %v353_v40 }
  0x34   : >> { %v318_v30 = vmul.u32 2221713035, %v316_v27  ;;  %v319_v31 = vshrl.u32 %v317_v29, 16  ;;  %v358_v46 = vxor.u32 %v356_v44, %v354_v41  ;;  %v359_v48 = vmul.u32 2221713035, %v357_v45 }
  0x36   : >> { %v320_v34 = vshrl.u32 %v318_v30, 16  ;;  %v321_v35 = vxor.u32 %v319_v31, %v317_v29  ;;  %v360_v49 = vmul.u32 2221713035, %v358_v46  ;;  %v361_v50 = vshrl.u32 %v359_v48, 16 }
  0x38   : >> { %v322_v38 = vxor.u32 %v320_v34, %v318_v30  ;;  %v323_v39 = vxor.u32 %v321_v35, %v304_v14  ;;  %v362_v51 = vshrl.u32 %v360_v49, 16  ;;  %v363_v53 = vxor.u32 %v361_v50, %v359_v48 }
  0x3a   : >> { %v324_v42 = vxor.u32 %v322_v38, %v304_v14  ;;  %v325_v47 = vshrl.u32 %v323_v39, 16  ;;  %v364_v54 = vxor.u32 %v362_v51, %v360_v49  ;;  %v365_v55 = vxor.u32 %v363_v53, %v304_v14 }
  0x3c   : >> { %v327_v52 = vxor.u32 %v325_v47, %v323_v39  ;;  %v366_v56 = vxor.u32 %v364_v54, %v304_v14  ;;  %v367_v58 = vshrl.u32 %v365_v55, 16  ;;  %v326_v4 = vshrl.u32 %v324_v42, 16 }
  0x3e   : >> { %v329_v57 = vmul.u32 2146121005, %v327_v52  ;;  %v368_v59 = vshrl.u32 %v366_v56, 16  ;;  %v369_v60 = vxor.u32 %v367_v58, %v365_v55  ;;  %v328_v10 = vxor.u32 %v326_v4, %v324_v42 }
  0x3f   : >> { %v1515_v55 = vmov 683565275   ;;  %v1516_v58 = vmov 2475754826  }
  0x40   : >> { %v370_v61 = vxor.u32 %v368_v59, %v366_v56  ;;  %v331_v62 = vshrl.u32 %v329_v57, 15  ;;  %v371_v63 = vmul.u32 2146121005, %v369_v60  ;;  %v330_v14 = vmul.u32 2146121005, %v328_v10 }
  0x41   : >> { %v1517_v60 = vmov 2131351028  }
  0x42   : >> { %v372_v5 = vmul.u32 2146121005, %v370_v61  ;;  %v373_v6 = vshrl.u32 %v371_v63, 15  ;;  %v333_v8 = vxor.u32 %v331_v62, %v329_v57  ;;  %v332_v22 = vshrl.u32 %v330_v14, 15 }
  0x43   : >> { %v1518_v62 = vmov 2102212464  }
  0x44   : >> { %v374_v7 = vshrl.u32 %v372_v5, 15  ;;  %v375_v9 = vxor.u32 %v373_v6, %v371_v63  ;;  %v335_v15 = vmul.u32 2221713035, %v333_v8  ;;  %v334_v28 = vxor.u32 %v332_v22, %v330_v14 }
  0x45   : >> { %v1519_v6 = vmov 920167782  }
  0x46   : >> { %v376_v11 = vxor.u32 %v374_v7, %v372_v5  ;;  %v377_v12 = vmul.u32 2221713035, %v375_v9  ;;  %v337_v20 = vshrl.u32 %v335_v15, 16  ;;  %v336_v33 = vmul.u32 2221713035, %v334_v28 }
  0x48   : >> { %v378_v13 = vmul.u32 2221713035, %v376_v11  ;;  %v379_v16 = vshrl.u32 %v377_v12, 16  ;;  %v339_v26 = vxor.u32 %v337_v20, %v335_v15  ;;  %v338_v39 = vshrl.u32 %v336_v33, 16 }
  0x4a   : >> { %v380_v17 = vshrl.u32 %v378_v13, 16  ;;  %v381_v18 = vxor.u32 %v379_v16, %v377_v12  ;;  %v341_v31 = vshrl.u32 %v339_v26, 8  ;;  %v1633_v45 = vxor.u32 %v338_v39, %v336_v33 }
  0x4b   : >> { %v1520_v12 = vmov 1326507024  }
  0x4c   : >> { %v382_v19 = vxor.u32 %v380_v17, %v378_v13  ;;  %v383_v21 = vshrl.u32 %v381_v18, 8  ;;  %v343_v36 = vcvt.s32.f32 %v341_v31  ;;  %v342_v52 = vshrl.u32 %v1633_v45, 8 }
  0x4e   : >> { %v384_v23 = vshrl.u32 %v382_v19, 8  ;;  %v385_v24 = vcvt.s32.f32 %v383_v21  ;;  %v345_v42 = vmul.f32 5.9604645e-08, %v343_v36 }
  0x50   : >> { %v386_v25 = vcvt.s32.f32 %v384_v23  ;;  %v387_v27 = vmul.f32 5.9604645e-08, %v385_v24  ;;  %v389_v49 = vsub.f32 1.0, %v345_v42 }
  0x52   : >> { %v388_v29 = vmul.f32 5.9604645e-08, %v386_v25  ;;  %v1624_v30 = vmul.f32 6.2831855, %v387_v27  ;;  %1402 = vlog2.f32 %v389_v49 }
  0x54   : >> { %v1626_v32 = vmul.f32 6.2831855, %v388_v29  ;;  %v426_v34 = vand.u32 2139095040, %v1624_v30  ;;  %v423_v37 = vand.u32 2147483647, %v1624_v30 }
  0x56   : >> { %v580_v35 = vand.u32 2139095040, %v1626_v32  ;;  %v427_v38 = vshrl.u32 %v426_v34, 23  ;;  %v430_v43 = vand.u32 8388607, %v423_v37  ;;  %v577_v48 = vand.u32 2147483647, %v1626_v32 }
  0x58   : >> { %v1281_v40 = vadd.s32 4294967169, %v427_v38  ;;  %v581_v41 = vshrl.u32 %v580_v35, 23  ;;  %v431_v50 = vor.u32 8388608, %v430_v43  ;;  %v584_v4 = vand.u32 8388607, %v577_v48  ;;  %v1661_v24 = vpop.eup %1402 }
  0x5a   : >> { %v433_v44 = vadd.s32 1, %v1281_v40  ;;  %v1284_v46 = vadd.s32 4294967169, %v581_v41  ;;  %v1647_v8 = vshll.u32 %v431_v50, 8  ;;  %v585_v18 = vor.u32 8388608, %v584_v4 }
  0x5c   : >> { %vm434_vm0 = vcmp.gt.s32.totalorder %v433_v44, 0  ;;  %v587_v57 = vadd.s32 1, %v1284_v46  ;;  %v472_v21 = vand.u32 65535, %v1647_v8  ;;  %v473_v28 = vshrl.u32 %v1647_v8, 16 }
  0x5d   : >> { %v435_v47 = vsel %vm434_vm0, %v433_v44, 0  ;;  %v1670_v34 = vshll.u32 %v585_v18, 8  ;;  %v1521_v18 = vmov 0  }
  0x5e   : >> { %v437_v51 = vand.u32 31, %v435_v47  ;;  %v1637_v53 = vshrl.u32 %v435_v47, 5  ;;  %vm588_vm2 = vcmp.gt.s32.totalorder %v587_v57, 0 }
  0x5f   : >> { %v589_v23 = vsel %vm588_vm2, %v587_v57, 0 }
  0x60   : >> { %v438_v54 = vsub.s32 32, %v437_v51  ;;  %v440_v56 = vshll.u32 %v1515_v55, %v437_v51  ;;  %v443_v59 = vshll.u32 %v1516_v58, %v437_v51  ;;  %v446_v61 = vshll.u32 %v1517_v60, %v437_v51 }
  0x61   : >> { %v449_v63 = vshll.u32 %v1518_v62, %v437_v51  ;;  %v452_v7 = vshll.u32 %v1519_v6, %v437_v51  ;;  %vm455_vm1 = vcmp.lt.s32.totalorder %v1637_v53, 1  ;;  %vm457_vm3 = vcmp.lt.s32.totalorder %v1637_v53, 3 }
  0x62   : >> { %v441_v5 = vshrl.u32 %v1516_v58, %v438_v54  ;;  %v444_v9 = vshrl.u32 %v1517_v60, %v438_v54  ;;  %v447_v10 = vshrl.u32 %v1518_v62, %v438_v54  ;;  %v450_v11 = vshrl.u32 %v1519_v6, %v438_v54 }
  0x63   : >> { %v453_v13 = vshrl.u32 %v1520_v12, %v438_v54  ;;  %v439_v19 = vshrl.u32 %v1515_v55, %v438_v54  ;;  %vm456_vm4 = vcmp.lt.s32.totalorder %v1637_v53, 2  ;;  %vm458_vm5 = vcmp.lt.s32.totalorder %v1637_v53, 4 }
  0x64   : >> { %v442_v15 = vor.u32 %v441_v5, %v440_v56  ;;  %v445_v16 = vor.u32 %v444_v9, %v443_v59  ;;  %v448_v14 = vor.u32 %v447_v10, %v446_v61  ;;  %v451_v17 = vor.u32 %v450_v11, %v449_v63 }
  0x65   : >> { %v454_v20 = vor.u32 %v453_v13, %v452_v7  ;;  %v591_v39 = vand.u32 31, %v589_v23  ;;  %v1680_v46 = vshrl.u32 %v589_v23, 5  ;;  %v197_v53 = vstv %s1691_s21  ;;  %s1871_s21 = sld [smem:[#allocation5 + $0x181]] }
  0x66   : >> { %v463_v22 = vsel %vm455_vm1, %v442_v15, %v445_v16  ;;  %v464_v25 = vsel %vm458_vm5, %v451_v17, 920167782  ;;  %v467_v26 = vsel %vm455_vm1, %v445_v16, %v448_v14  ;;  %v460_v29 = vsel %vm458_vm5, %v448_v14, 2102212464 }
  0x67   : >> { %v468_v27 = vsel %vm458_vm5, %v454_v20, 1326507024  ;;  %v465_v31 = vsel %vm457_vm3, %v448_v14, %v464_v25  ;;  %v459_v35 = vsel %vm455_vm1, %v439_v19, %v442_v15  ;;  %v461_v44 = vsel %vm457_vm3, %v445_v16, %v460_v29 }
  0x68   : >> { %v469_v33 = vsel %vm457_vm3, %v451_v17, %v468_v27  ;;  %v466_v36 = vsel %vm456_vm4, %v463_v22, %v465_v31  ;;  %v1682_v47 = vsub.s32 32, %v591_v39  ;;  %v594_v49 = vshll.u32 %v1515_v55, %v591_v39 }
  0x69   : >> { %v470_v38 = vsel %vm456_vm4, %v467_v26, %v469_v33  ;;  %v496_v42 = vand.u32 65535, %v466_v36  ;;  %v497_v43 = vshrl.u32 %v466_v36, 16  ;;  %v597_v56 = vshll.u32 %v1516_v58, %v591_v39 }
  0x6a   : >> { %v474_v40 = vand.u32 65535, %v470_v38  ;;  %v475_v41 = vshrl.u32 %v470_v38, 16  ;;  %v595_v17 = vshrl.u32 %v1516_v58, %v1682_v47  ;;  %v600_v33 = vshll.u32 %v1517_v60, %v591_v39 }
  0x6b   : >> { %v498_v59 = vmul.u32 %v496_v42, %v472_v21  ;;  %v499_v61 = vmul.u32 %v497_v43, %v472_v21  ;;  %v500_v63 = vmul.u32 %v496_v42, %v473_v28  ;;  %v501_v9 = vmul.u32 %v497_v43, %v473_v28 }
  0x6c   : >> { %v476_v50 = vmul.u32 %v474_v40, %v472_v21  ;;  %v477_v51 = vmul.u32 %v475_v41, %v472_v21  ;;  %v478_v54 = vmul.u32 %v474_v40, %v473_v28  ;;  %v479_v57 = vmul.u32 %v475_v41, %v473_v28 }
  0x6d   : >> { %v502_v11 = vshll.u32 %v499_v61, 16  ;;  %v503_v13 = vshrl.u32 %v499_v61, 16  ;;  %v504_v15 = vshll.u32 %v500_v63, 16  ;;  %v505_v14 = vshrl.u32 %v500_v63, 16 }
  0x6e   : >> { %v480_v4 = vshll.u32 %v477_v51, 16  ;;  %v481_v5 = vshrl.u32 %v477_v51, 16  ;;  %v482_v7 = vshll.u32 %v478_v54, 16  ;;  %v483_v10 = vshrl.u32 %v478_v54, 16 }
  0x6f   : >> { %vm506_vm7 = vc.u32 %v498_v59, %v502_v11  ;;  %v508_v20 = vadd.s32 %v502_v11, %v498_v59  ;;  %v598_v21 = vshrl.u32 %v1517_v60, %v1682_v47  ;;  %v1694_v25 = vor.u32 %v595_v17, %v594_v49 }
  0x70   : >> { %vm484_vm6 = vc.u32 %v476_v50, %v480_v4  ;;  %v486_v16 = vadd.s32 %v480_v4, %v476_v50  ;;  %v507_v23 = vsel %vm506_vm7, 1, %v1521_v18  ;;  %v601_v38 = vshrl.u32 %v1518_v62, %v1682_v47 }
  0x71   : >> { %v485_v19 = vsel %vm484_vm6, 1, %v1521_v18  ;;  %v509_v27 = vadd.s32 %v507_v23, %v501_v9  ;;  %vm510_vm9 = vc.u32 %v508_v20, %v504_v15  ;;  %v1697_v58 = vadd.s32 %v508_v20, %v504_v15 }
  0x72   : >> { %v487_v22 = vadd.s32 %v485_v19, %v479_v57  ;;  %vm488_vm8 = vc.u32 %v486_v16, %v482_v7  ;;  %v511_v29 = vsel %vm510_vm9, 1, %v1521_v18  ;;  %v1700_v31 = vor.u32 %v598_v21, %v597_v56 }
  0x73   : >> { %v489_v26 = vsel %vm488_vm8, 1, %v1521_v18  ;;  %v513_v36 = vadd.s32 %v511_v29, %v509_v27  ;;  %v603_v40 = vshll.u32 %v1518_v62, %v591_v39  ;;  %v604_v41 = vshrl.u32 %v1519_v6, %v1682_v47 }
  0x74   : >> { %v491_v28 = vadd.s32 %v489_v26, %v487_v22  ;;  %v606_v43 = vshll.u32 %v1519_v6, %v591_v39  ;;  %v607_v49 = vshrl.u32 %v1520_v12, %v1682_v47  ;;  %vm609_vm10 = vcmp.lt.s32.totalorder %v1680_v46, 1 }
  0x75   : >> { %v462_v60 = vsel %vm456_vm4, %v459_v35, %v461_v44  ;;  %v514_v50 = vadd.s32 %v513_v36, %v503_v13  ;;  %v602_v51 = vor.u32 %v601_v38, %v600_v33  ;;  %v605_v62 = vor.u32 %v604_v41, %v603_v40 }
  0x76   : >> { %v492_v42 = vadd.s32 %v491_v28, %v481_v5  ;;  %v608_v56 = vor.u32 %v607_v49, %v606_v43  ;;  %vm611_vm11 = vcmp.lt.s32.totalorder %v1680_v46, 3  ;;  %vm612_vm12 = vcmp.lt.s32.totalorder %v1680_v46, 4 }
  0x77   : >> { %v515_v57 = vadd.s32 %v514_v50, %v505_v14  ;;  %vm610_vm13 = vcmp.lt.s32.totalorder %v1680_v46, 2  ;;  %v617_v6 = vsel %vm609_vm10, %v1694_v25, %v1700_v31  ;;  %v516_v12 = vmul.u32 %v1647_v8, %v462_v60 }
  0x78   : >> { %v1716_v54 = vadd.s32 %v492_v42, %v483_v10  ;;  %v618_v35 = vsel %vm612_vm12, %v605_v62, 920167782  ;;  %v344_v39 = vcvt.s32.f32 %v342_v52  ;;  %v621_v61 = vsel %vm609_vm10, %v1700_v31, %v602_v51 }
  0x79   : >> { %v519_v44 = vadd.s32 1, %v515_v57  ;;  %v619_v59 = vsel %vm611_vm11, %v602_v51, %v618_v35  ;;  %v622_v63 = vsel %vm612_vm12, %v608_v56, 1326507024  ;;  %v626_v4 = vand.u32 65535, %v1670_v34 }
  0x7a   : >> { %vm518_vm14 = vc.u32 %v1716_v54, %v1697_v58  ;;  %v620_v8 = vsel %vm610_vm13, %v617_v6, %v619_v59  ;;  %v627_v5 = vshrl.u32 %v1670_v34, 16  ;;  %v623_v52 = vsel %vm611_vm11, %v605_v62, %v622_v63 }
  0x7b   : >> { %v520_v45 = vsel %vm518_vm14, %v519_v44, %v515_v57  ;;  %v650_v7 = vand.u32 65535, %v620_v8  ;;  %v651_v9 = vshrl.u32 %v620_v8, 16  ;;  %v200_v10 = vstv %s1708_s22  ;;  %s1876_s22 = sadd.s32 %s1325_s19, %s1793_s28  ;;  %s1988_s28 = sld [smem:[#allocation4 + %s270_s26]] }
  0x7c   : >> { %v392_v11 = vmul.f32 0.6931472, %v1661_v24  ;;  %v521_v13 = vadd.s32 %v520_v45, %v516_v12  ;;  %v624_v15 = vsel %vm610_vm13, %v621_v61, %v623_v52  ;;  %v1750_v16 = vmul.f32 5.9604645e-08, %v344_v39  ;;  %s1945_s25 = sld [smem:[#allocation3 + %s1876_s22]] }
  0x7d   : >> { %v593_v14 = vshrl.u32 %v1515_v55, %v1682_v47  ;;  %v628_v17 = vand.u32 65535, %v624_v15  ;;  %v629_v19 = vshrl.u32 %v624_v15, 16  ;;  %v652_v21 = vmul.u32 %v650_v7, %v626_v4  ;;  %s1305_s19 = sld [smem:[#allocation5 + $0x101]] (%p179_p5) }
  0x7e   : >> { %v522_v20 = vadd.s32 536870912, %v521_v13  ;;  %v653_v22 = vmul.u32 %v651_v9, %v626_v4  ;;  %v654_v23 = vmul.u32 %v650_v7, %v627_v5  ;;  %v614_v26 = vsel %vm612_vm12, %v602_v51, 2102212464 }
  0x7f   : >> { %v630_v27 = vmul.u32 %v628_v17, %v626_v4  ;;  %v631_v24 = vmul.u32 %v629_v19, %v626_v4  ;;  %v632_v28 = vmul.u32 %v628_v17, %v627_v5  ;;  %v1758_v29 = vmul.f32 -2.0, %v392_v11 }
  0x80   : >> { %v1760_v33 = vshrl.u32 %v522_v20, 30  ;;  %v655_v36 = vmul.u32 %v651_v9, %v627_v5  ;;  %v656_v55 = vshll.u32 %v653_v22, 16  ;;  %v633_v47 = vmul.u32 %v629_v19, %v627_v5 }
  0x81   : >> { %v634_v38 = vshll.u32 %v631_v24, 16  ;;  %v636_v40 = vshll.u32 %v632_v28, 16  ;;  %v658_v41 = vshll.u32 %v654_v23, 16  ;;  %v613_v43 = vsel %vm609_vm10, %v593_v14, %v1694_v25 }
  0x82   : >> { %v524_v42 = vshll.u32 %v1760_v33, 30  ;;  %v615_v49 = vsel %vm611_vm11, %v1700_v31, %v614_v26  ;;  %vm660_vm15 = vc.u32 %v652_v21, %v656_v55  ;;  %v662_v51 = vadd.s32 %v656_v55, %v652_v21 }
  0x83   : >> { %vm638_vm0 = vc.u32 %v630_v27, %v634_v38  ;;  %v640_v60 = vadd.s32 %v634_v38, %v630_v27  ;;  %v661_v50 = vsel %vm660_vm15, 1, %v1521_v18  ;;  %v657_v57 = vshrl.u32 %v653_v22, 16 }
  0x84   : >> { %v1772_v62 = vsub.s32 %v521_v13, %v524_v42  ;;  %v639_v56 = vsel %vm638_vm0, 1, %v1521_v18  ;;  %v663_v6 = vadd.s32 %v661_v50, %v655_v36  ;;  %v635_v25 = vshrl.u32 %v631_v24, 16 }
  0x85   : >> { %v641_v12 = vadd.s32 %v639_v56, %v633_v47  ;;  %vm642_vm1 = vc.u32 %v640_v60, %v636_v40  ;;  %vm664_vm2 = vc.u32 %v662_v51, %v658_v41  ;;  %v637_v44 = vshrl.u32 %v632_v28, 16 }
  0x86   : >> { %vm526_vm3 = vcmp.lt.s32.totalorder %v1772_v62, 0  ;;  %v527_v31 = vsub.s32 0, %v1772_v62  ;;  %v643_v35 = vsel %vm642_vm1, 1, %v1521_v18  ;;  %v665_v39 = vsel %vm664_vm2, 1, %v1521_v18 }
  0x87   : >> { %v645_v59 = vadd.s32 %v643_v35, %v641_v12  ;;  %v659_v61 = vshrl.u32 %v654_v23, 16  ;;  %v667_v8 = vadd.s32 %v665_v39, %v663_v6  ;;  %v198_v63 = vmul.f32 %v1506_v0, %v197_v53 }
  0x88   : >> { %v201_v4 = vmul.f32 %v1502_v1, %v200_v10  ;;  %v204_v5 = vstv %s1756_s23  ;;  %v528_v45 = vsel %vm526_vm3, %v527_v31, %v1772_v62  ;;  %v390_v52 = vsub.f32 1.0, %v1750_v16  ;;  %s1898_s23 = sld [smem:[#allocation4 + %s1876_s22]] }
  0x89   : >> { %v529_v18 = vclz %v528_v45  ;;  %v646_v7 = vadd.s32 %v645_v59, %v635_v25  ;;  %v668_v9 = vadd.s32 %v667_v8, %v657_v57  ;;  %1404 = vrsqrt.f32 %v1758_v29  ;;  %s2057_s22 = sld [smem:[#allocation4 + $0x107]] (%p179_p5) }
  0x8a   : >> { %v616_v53 = vsel %vm610_vm13, %v613_v43, %v615_v49  ;;  %v1798_v10 = vadd.s32 %v662_v51, %v658_v41  ;;  %v202_v16 = vadd.f32 %v201_v4, %v198_v63  ;;  %v205_v14 = vmul.f32 %v1498_v2, %v204_v5 }
  0x8b   : >> { %v1282_v11 = vadd.s32 4294967294, %v529_v18  ;;  %v1804_v13 = vadd.s32 %v646_v7, %v637_v44  ;;  %v669_v15 = vadd.s32 %v668_v9, %v659_v61  ;;  %v208_v17 = vstv %s1770_s24  ;;  %s1917_s24 = sld [smem:[#allocation5 + $0x182]] }
  0x8c   : >> { %1406 = vlog2.f32 %v390_v52  ;;  %v517_v46 = vadd.s32 %v1697_v58, %v1716_v54  ;;  %v670_v19 = vmul.u32 %v1670_v34, %v616_v53  ;;  %v206_v34 = vadd.f32 %v205_v14, %v202_v16 }
  0x8d   : >> { %vm1283_vm4 = vcmp.lt.s32.totalorder %v1282_v11, 0  ;;  %vm672_vm5 = vc.u32 %v1804_v13, %v1798_v10  ;;  %v673_v21 = vadd.s32 1, %v669_v15  ;;  %v209_v26 = vmul.f32 %v1494_v3, %v208_v17 }
  0x8e   : >> { %v532_v20 = vsel %vm1283_vm4, 0, %v1282_v11  ;;  %v1834_v55 = vstv %s1790_s27  ;;  %v212_v49 = vstv %s1802_s30  ;;  %v215_v60 = vstv %s1808_s0  ;;  %s1950_s27 = sld [smem:[#allocation5 + $0x183]] }
  0x8f   : >> { %v533_v22 = vsub.s32 32, %v532_v20  ;;  %v534_v23 = vshll.u32 %v1772_v62, %v532_v20  ;;  %v537_v58 = vsub.s32 4294967266, %v532_v20  ;;  %v1826_v54 = vpop.eup %1404  ;;  %v674_v27 = vsel %vm672_vm5, %v673_v21, %v669_v15  ;;  %s1980_s30 = sld [smem:[#allocation4 + %s1816_s9]] }
  0x90   : >> { %v675_v36 = vadd.s32 %v674_v27, %v670_v19  ;;  %v398_v38 = vmul.f32 %v1826_v54, %v1758_v29  ;;  %v210_v43 = vadd.f32 %v209_v26, %v206_v34  ;;  %v233_v50 = vstv %s1810_s8  ;;  %s1293_s0 = sld [smem:[#allocation3 + $0x7]] (%p179_p5) }
  0x91   : >> { %v535_v24 = vshrl.u32 %v517_v46, %v533_v22  ;;  %v538_v28 = vadd.s32 127, %v537_v58  ;;  %v236_v57 = vstv %s1818_s10  ;;  %v1850_v6 = vmul.f32 %v1506_v0, %v1834_v55  ;;  %s2043_s8 = sld [smem:[#allocation3 + $0x87]] (%p179_p5) }
  0x92   : >> { %v1407_v47 = vpop.eup %1406  ;;  %v676_v42 = vadd.s32 536870912, %v675_v36  ;;  %v1854_v25 = vmul.f32 %v1498_v2, %v1834_v55  ;;  %v1860_v31 = vstv %s1823_s11  ;;  %v399_v35 = vmul.f32 %v1826_v54, %v398_v38  ;;  %s1056_s9 = sld [smem:[#allocation5]] (%p179_p5) }
  0x93   : >> { %v536_v40 = vor.u32 %v535_v24, %v534_v23  ;;  %v539_v41 = vshll.u32 %v538_v28, 23  ;;  %v394_v12 = vmul.f32 0.6931472, %v1407_v47  ;;  %v213_v59 = vadd.f32 %v212_v49, %v210_v43  ;;  %s1295_s10 = sld [smem:[#allocation5 + $0x1]] (%p179_p5) }
  0x94   : >> { %v1845_v56 = vshrl.u32 %v676_v42, 30  ;;  %v216_v61 = vmul.f32 %v1506_v0, %v215_v60  ;;  %v218_v8 = vstv %s1829_s12  ;;  %v234_v63 = vmul.f32 %v1506_v0, %v233_v50  ;;  %s1296_s11 = sld [smem:[#allocation5 + $0x2]] (%p179_p5) }
  0x95   : >> { %v540_v51 = vor.u32 4788187, %v539_v41  ;;  %v543_v62 = vcvt.s32.f32 %v536_v40  ;;  %v237_v4 = vmul.f32 %v1502_v1, %v236_v57  ;;  %v240_v5 = vstv %s1831_s13  ;;  %s1297_s12 = sld [smem:[#allocation5 + $0x3]] (%p179_p5) }
  0x96   : >> { %v678_v44 = vshll.u32 %v1845_v56, 30  ;;  %v1878_v18 = vmul.f32 -2.0, %v394_v12  ;;  %vm1882_vm6 = vcmp.le.f32.partialorder %v423_v37, 0.7853982  ;;  %vm425_vm7 = vcmp.lt.s32.totalorder %v1624_v30, 0  ;;  %s2045_s13 = sld [smem:[#allocation4 + $0x7]] (%p179_p5) }
  0x97   : >> { %v541_v39 = vand.u32 2147483647, %v540_v51  ;;  %v547_v9 = vsub.s32 4, %v1760_v33  ;;  %v400_v53 = vmul.f32 0.5, %v399_v35  ;;  %v219_v16 = vmul.f32 %v1502_v1, %v218_v8 }
  0x98   : >> { %v1873_v52 = vsub.s32 %v675_v36, %v678_v44  ;;  %v222_v14 = vstv %s1840_s14  ;;  %v241_v17 = vmul.f32 %v1498_v2, %v240_v5  ;;  %v1894_v37 = vmul.f32 %v1860_v31, %v213_v59  ;;  %s1299_s14 = sld [smem:[#allocation5 + $0x80]] (%p179_p5) }
  0x99   : >> { %v544_v45 = vmul.f32 %v543_v62, %v541_v39  ;;  %v238_v46 = vadd.f32 %v237_v4, %v234_v63  ;;  %v244_v19 = vstv %s1843_s17  ;;  %1408 = vrsqrt.f32 %v1878_v18  ;;  %s1300_s17 = sld [smem:[#allocation5 + $0x81]] (%p179_p5) }
  0x9a   : >> { %vm680_vm8 = vcmp.lt.s32.totalorder %v1873_v52, 0  ;;  %v681_v15 = vsub.s32 0, %v1873_v52  ;;  %v548_v22 = vsel %vm425_vm7, %v547_v9, %v1760_v33  ;;  %v1911_v34 = vmul.f32 %v1498_v2, %v222_v14 }
  0x9b   : >> { %v545_v11 = vxor.u32 2147483648, %v544_v45  ;;  %v226_v26 = vstv %s1856_s18  ;;  %v401_v27 = vsub.f32 1.5, %v400_v53  ;;  %v1914_v28 = vadd.f32 %v219_v16, %v216_v61  ;;  %s1301_s18 = sld [smem:[#allocation5 + $0x82]] (%p179_p5) }
  0x9c   : >> { %v682_v21 = vsel %vm680_vm8, %v681_v15, %v1873_v52  ;;  %v245_v36 = vmul.f32 %v1494_v3, %v244_v19  ;;  %v284_v33 = vsub.f32 %v1850_v6, %v1894_v37  ;;  %v254_v38 = vstv %s1867_s20  ;;  %s1306_s20 = sld [smem:[#allocation5 + $0x102]] (%p179_p5) }
  0x9d   : >> { %v546_v20 = vsel %vm425_vm7, %v545_v11, %v544_v45  ;;  %v683_v58 = vclz %v682_v21  ;;  %v550_v40 = vsel %vm1882_vm6, 0, %v548_v22  ;;  %v242_v43 = vadd.f32 %v241_v17, %v238_v46 }
  0x9e   : >> { %v549_v23 = vsel %vm1882_vm6, %v1624_v30, %v546_v20  ;;  %v257_v49 = vstv %s1871_s21  ;;  %v671_v60 = vadd.s32 %v1798_v10, %v1804_v13  ;;  %v402_v50 = vmul.f32 %v1826_v54, %v401_v27  ;;  %s1307_s21 = sld [smem:[#allocation5 + $0x103]] (%p179_p5) }
  0x9f   : >> { %v551_v24 = vmul.f32 %v549_v23, %v549_v23  ;;  %v1285_v47 = vadd.s32 4294967294, %v683_v58  ;;  %v1928_v12 = vpop.eup %1408  ;;  %v877_v59 = vadd.s32 3, %v550_v40  ;;  %v251_v61 = vstv %s1898_s23  ;;  %s1309_s23 = sld [smem:[#allocation5 + $0x180]] (%p179_p5) }
  0xa0   : >> { %v1933_v8 = vmul.f32 %v1506_v0, %v254_v38  ;;  %v246_v13 = vadd.f32 %v245_v36, %v242_v43  ;;  %v1936_v54 = vmul.f32 %v1502_v1, %v257_v49  ;;  %v403_v45 = vmul.f32 %v402_v50, %v1758_v29 }
  0xa1   : >> { %v552_v41 = vmul.f32 -0.001358992, %v551_v24  ;;  %v559_v42 = vmul.f32 -0.00019511016, %v551_v24  ;;  %vm1286_vm9 = vcmp.lt.s32.totalorder %v1285_v47, 0  ;;  %v567_v53 = vand.u32 3, %v550_v40 }
  0xa2   : >> { %v686_v57 = vsel %vm1286_vm9, 0, %v1285_v47  ;;  %v878_v15 = vand.u32 3, %v877_v59  ;;  %v261_v16 = vstv %s1917_s24  ;;  %vm404_vm10 = vcmp.eq.f32.partialorder %v1758_v29, inf  ;;  %s1310_s24 = sld [smem:[#allocation5 + $0x181]] (%p179_p5) }
  0xa3   : >> { %v553_v51 = vadd.f32 0.041655596, %v552_v41  ;;  %v560_v62 = vadd.f32 0.008332121, %v559_v42  ;;  %v687_v35 = vsub.s32 32, %v686_v57  ;;  %v688_v39 = vshll.u32 %v1873_v52, %v686_v57 }
  0xa4   : >> { %v691_v44 = vsub.s32 4294967266, %v686_v57  ;;  %v410_v52 = vmul.f32 %v1928_v12, %v1878_v18  ;;  %v252_v46 = vadd.f32 %v251_v61, %v246_v13  ;;  %vm406_vm11 = vcmp.eq.f32.partialorder %v1758_v29, 0.0 }
  0xa5   : >> { %v554_v63 = vmul.f32 %v553_v51, %v551_v24  ;;  %v561_v10 = vmul.f32 %v560_v62, %v551_v24  ;;  %v689_v4 = vshrl.u32 %v671_v60, %v687_v35  ;;  %v407_v21 = vand.u32 2147483648, %v1758_v29 }
  0xa6   : >> { %v692_v5 = vadd.s32 127, %v691_v44  ;;  %v411_v22 = vmul.f32 %v1928_v12, %v410_v52  ;;  %v405_v36 = vsel %vm404_vm10, %v1758_v29, %v403_v45  ;;  %vm572_vm12 = vcmp.eq.s32.totalorder %v567_v53, 2 }
  0xa7   : >> { %v555_v7 = vadd.f32 -0.4999988, %v554_v63  ;;  %v562_v9 = vadd.f32 -0.16666654, %v561_v10  ;;  %v690_v11 = vor.u32 %v689_v4, %v688_v39  ;;  %vm883_vm13 = vcmp.eq.s32.totalorder %v878_v15, 2 }
  0xa8   : >> { %v693_v0 = vshll.u32 %v692_v5, 23  ;;  %vm568_vm14 = vcmp.lt.s32.totalorder %v567_v53, 2  ;;  %vm579_vm15 = vcmp.lt.s32.totalorder %v1626_v32, 0  ;;  %vm569_vm0 = vcmp.eq.s32.totalorder %v567_v53, 0 }
  0xa9   : >> { %v556_v14 = vmul.f32 %v555_v7, %v551_v24  ;;  %v563_v17 = vmul.f32 %v562_v9, %v551_v24  ;;  %v697_v20 = vcvt.s32.f32 %v690_v11  ;;  %v701_v41 = vsub.s32 4, %v1845_v56 }
  0xaa   : >> { %v694_v19 = vor.u32 4788187, %v693_v0  ;;  %vm880_vm1 = vcmp.eq.s32.totalorder %v878_v15, 0  ;;  %vm879_vm2 = vcmp.lt.s32.totalorder %v878_v15, 2  ;;  %v282_v60 = vmul.f32 %v1860_v31, %v252_v46 }
  0xab   : >> { %v557_v58 = vadd.f32 1.0, %v556_v14  ;;  %v564_v27 = vadd.f32 1.0, %v563_v17  ;;  %vm566_vm3 = vweird.f32 %v1624_v30  ;;  %vm1959_vm4 = vcmp.le.f32.partialorder %v577_v48, 0.7853982 }
  0xac   : >> { %v695_v47 = vand.u32 2147483647, %v694_v19  ;;  %v408_v51 = vsel %vm406_vm11, %v407_v21, %v405_v36  ;;  %v412_v62 = vmul.f32 0.5, %v411_v22  ;;  %v702_v48 = vsel %vm579_vm15, %v701_v41, %v1845_v56 }
  0xad   : >> { %v565_v24 = vmul.f32 %v564_v27, %v549_v23  ;;  %v573_v38 = vxor.u32 2147483648, %v557_v58  ;;  %v1976_v63 = vstv %s1945_s25  ;;  %v286_v10 = vsub.f32 %v1854_v25, %v282_v60  ;;  %s1311_s25 = sld [smem:[#allocation5 + $0x182]] (%p179_p5) }
  0xae   : >> { %v698_v40 = vmul.f32 %v697_v20, %v695_v47  ;;  %v259_v56 = vadd.f32 %v1936_v54, %v1933_v8  ;;  %v262_v45 = vmul.f32 %v1498_v2, %v261_v16  ;;  %v265_v52 = vstv %s1950_s27  ;;  %s1312_s27 = sld [smem:[#allocation5 + $0x183]] (%p179_p5) }
  0xaf   : >> { %v570_v42 = vxor.u32 2147483648, %v565_v24  ;;  %v574_v43 = vsel %vm572_vm12, %v573_v38, %v565_v24  ;;  %v885_v49 = vsel %vm883_vm13, %v573_v38, %v565_v24  ;;  %v704_v7 = vsel %vm1959_vm4, 0, %v702_v48 }
  0xb0   : >> { %v699_v50 = vxor.u32 2147483648, %v698_v40  ;;  %v227_v0 = vmul.f32 %v1494_v3, %v226_v26  ;;  %v413_v15 = vsub.f32 1.5, %v412_v62  ;;  %v224_v17 = vadd.f32 %v1911_v34, %v1914_v28 }
  0xb1   : >> { %v571_v57 = vsel %vm569_vm0, %v557_v58, %v570_v42  ;;  %v882_v35 = vsel %vm880_vm1, %v557_v58, %v570_v42  ;;  %v263_v46 = vadd.f32 %v262_v45, %v259_v56  ;;  %v266_v19 = vmul.f32 %v1494_v3, %v265_v52 }
  0xb2   : >> { %v575_v39 = vsel %vm568_vm14, %v571_v57, %v574_v43  ;;  %v700_v30 = vsel %vm579_vm15, %v699_v50, %v698_v40  ;;  %v886_v44 = vsel %vm879_vm2, %v882_v35, %v885_v49  ;;  %v1032_v20 = vadd.s32 3, %v704_v7 }
  0xb3   : >> { %v576_v59 = vsel %vm566_vm3, nan, %v575_v39  ;;  %v703_v29 = vsel %vm1959_vm4, %v1626_v32, %v700_v30  ;;  %v887_v61 = vsel %vm566_vm3, nan, %v886_v44  ;;  %v414_v22 = vmul.f32 %v1928_v12, %v413_v15 }
  0xb4   : >> { %v705_v13 = vmul.f32 %v703_v29, %v703_v29  ;;  %v731_v4 = vmul.f32 %v576_v59, %v408_v51  ;;  %v1043_v5 = vmul.f32 %v887_v61, %v408_v51  ;;  %v228_v6 = vadd.f32 %v227_v0, %v224_v17 }
  0xb5   : >> { %v267_v37 = vadd.f32 %v266_v19, %v263_v46  ;;  %v1033_v36 = vand.u32 3, %v1032_v20  ;;  %v230_v47 = vstv %s1980_s30  ;;  %v272_v24 = vstv %s1988_s28 }
  0xb6   : >> { %v706_v9 = vmul.f32 -0.001358992, %v705_v13  ;;  %v713_v53 = vmul.f32 -0.00019511016, %v705_v13  ;;  %v1046_v25 = vmul.f32 %v1976_v63, %v731_v4  ;;  %v1048_v11 = vmul.f32 %v1976_v63, %v1043_v5 }
  0xb7   : >> { %v415_v34 = vmul.f32 %v414_v22, %v1878_v18  ;;  %v276_v28 = vmul.f32 %v1502_v1, %v1834_v55  ;;  %vm416_vm5 = vcmp.eq.f32.partialorder %v1878_v18, inf  ;;  %v231_v12 = vadd.f32 %v230_v47, %v228_v6 }
  0xb8   : >> { %v707_v14 = vadd.f32 0.041655596, %v706_v9  ;;  %v714_v8 = vadd.f32 0.008332121, %v713_v53  ;;  %v1998_v2 = vadd.f32 %v1046_v25, %v284_v33   ;;  %v721_v33 = vand.u32 3, %v704_v7 }
  0xb9   : >> { %v273_v43 = vadd.f32 %v272_v24, %v267_v37  ;;  %vm1038_vm7 = vcmp.eq.s32.totalorder %v1033_v36, 2  ;;  %vm418_vm8 = vcmp.eq.f32.partialorder %v1878_v18, 0.0  ;;  %v419_v49 = vand.u32 2147483648, %v1878_v18 }
  0xba   : >> { %v2098_v54 = vmov %v1998_v2  ;;  %v2000_v2 = vadd.f32 %v1048_v11, %v286_v10   ;;  %v708_v26 = vmul.f32 %v707_v14, %v705_v13  ;;  %v715_v21 = vmul.f32 %v714_v8, %v705_v13 }
  0xbb   : >> { %vm726_vm6 = vcmp.eq.s32.totalorder %v721_v33, 2  ;;  %v417_v50 = vsel %vm416_vm5, %v1878_v18, %v415_v34  ;;  %vm722_vm9 = vcmp.lt.s32.totalorder %v721_v33, 2  ;;  %vm723_vm10 = vcmp.eq.s32.totalorder %v721_v33, 0 }
  0xbc   : >> { %v2099_v16 = vmov %v2000_v2  ;;  %v709_v58 = vadd.f32 -0.4999988, %v708_v26  ;;  %v716_v27 = vadd.f32 -0.16666654, %v715_v21  ;;  %vm1035_vm11 = vcmp.eq.s32.totalorder %v1033_v36, 0 }
  0xbd   : >> { %vm1034_vm12 = vcmp.lt.s32.totalorder %v1033_v36, 2  ;;  %v278_v57 = vmul.f32 %v1494_v3, %v1834_v55  ;;  %v281_v35 = vmul.f32 %v1860_v31, %v231_v12  ;;  %v283_v39 = vmul.f32 %v1860_v31, %v273_v43 }
  0xbe   : >> { %v710_v38 = vmul.f32 %v709_v58, %v705_v13  ;;  %v717_v40 = vmul.f32 %v716_v27, %v705_v13  ;;  %vm720_vm13 = vweird.f32 %v1626_v32  ;;  %v420_v30 = vsel %vm418_vm8, %v419_v49, %v417_v50 }
  0xbf   : >> { %v285_v13 = vsub.f32 %v276_v28, %v281_v35  ;;  %v287_v4 = vsub.f32 %v278_v57, %v283_v39  ;;  %v2103_v2 = vmov %v2099_v16  ;;  %v2105_v0 = vmov %v2098_v54 }
  0xc0   : >> { %v711_v41 = vadd.f32 1.0, %v710_v38  ;;  %v718_v42 = vadd.f32 1.0, %v717_v40  ;;  %v1057_v18 = vstv (%p179_p5), %s1056_s9  ;;  %v1060_v45 = vstv (%p179_p5), %s1295_s10 }
  0xc1   : > { %v1064_v7 = vstv (%p179_p5), %s1296_s11  ;;  %v1068_v53 = vstv (%p179_p5), %s1297_s12  ;;  %v1075_v0 = vstv (%p179_p5), %s1299_s14  ;;  %v1078_v8 = vstv (%p179_p5), %s1300_s17 }
  0xc2   : >> { %v719_v60 = vmul.f32 %v718_v42, %v703_v29  ;;  %v727_v23 = vxor.u32 2147483648, %v711_v41  ;;  %v1065_v9 = vmul.f32 (%p179_p5), %v1064_v7, %v2099_v16  ;;  %v1076_v14 = vmul.f32 (%p179_p5), %v1075_v0, %v2098_v54 }
  0xc3   : > { %v1072_v2 = vstv (%p179_p5), %s2045_s13  ;;  %v1128_v17 = vstv (%p179_p5), %s1293_s0  ;;  %v1082_v19 = vstv (%p179_p5), %s1301_s18  ;;  %v1086_v21 = vstv (%p179_p5), %s1302_s1 }
  0xc4   : >> { %v724_v1 = vxor.u32 2147483648, %v719_v60  ;;  %v728_v51 = vsel %vm726_vm6, %v727_v23, %v719_v60  ;;  %v1040_v62 = vsel %vm1038_vm7, %v727_v23, %v719_v60  ;;  %v1083_v26 = vmul.f32 (%p179_p5), %v1082_v19, %v2099_v16 }
  0xc5   : > { %v1133_v22 = vstv (%p179_p5), %s2043_s8  ;;  %v1129_v37 = vmul.f32 (%p179_p5), %v1128_v17, %v2098_v54  ;;  %v1093_v33 = vstv (%p179_p5), %s1304_s16  ;;  %v1096_v24 = vstv (%p179_p5), %s1305_s19 }
  0xc6   : >> { %v725_v48 = vsel %vm723_vm10, %v711_v41, %v724_v1  ;;  %v1037_v44 = vsel %vm1035_vm11, %v711_v41, %v724_v1  ;;  %v1094_v47 = vmul.f32 (%p179_p5), %v1093_v33, %v2098_v54  ;;  %v1090_v40 = vstv (%p179_p5), %s2050_s3 }
  0xc7   : >> { %v729_v59 = vsel %vm722_vm9, %v725_v48, %v728_v51  ;;  %v1041_v29 = vsel %vm1034_vm12, %v1037_v44, %v1040_v62  ;;  %v1100_v28 = vstv (%p179_p5), %s1306_s20  ;;  %v1104_v12 = vstv (%p179_p5), %s1307_s21 }
  0xc8   : >> { %v730_v61 = vsel %vm720_vm13, nan, %v729_v59  ;;  %v1042_v10 = vsel %vm720_vm13, nan, %v1041_v29  ;;  %v1101_v42 = vmul.f32 (%p179_p5), %v1100_v28, %v2099_v16  ;;  %v1114_v35 = vstv (%p179_p5), %s1310_s24 }
  0xc9   : >> { %v732_v5 = vmul.f32 %v730_v61, %v420_v30  ;;  %v1044_v56 = vmul.f32 %v1042_v10, %v420_v30  ;;  %v1108_v30 = vstv (%p179_p5), %s2057_s22  ;;  %v1118_v44 = vstv (%p179_p5), %s1311_s25 }
  0xca   : > { %v1119_v29 = vmul.f32 (%p179_p5), %v1118_v44, %v2099_v16  ;;  %v1122_v61 = vstv (%p179_p5), %s1312_s27 }
  0xcb   : >> { %v1047_v3 = vmul.f32 %v1976_v63, %v732_v5  ;;  %v1049_v55 = vmul.f32 %v1976_v63, %v1044_v56  ;;  %v1058_v63 = vmul.f32 (%p179_p5), %v1057_v18, %v2098_v54  ;;  %v1126_v18 = vstv (%p179_p5), %s1313_s29 }
  0xcc   : > { %181 = sbr.rel (!%p179_p5) target bundleno = 28 (0x1c), region = 61 }
  0xcd   : >> { %v2024_v1 = vadd.f32 %v1047_v3, %v285_v13   ;;  %v2026_v3 = vadd.f32 %v1049_v55, %v287_v4  }
  0xcf   : >> { %v2100_v31 = vmov %v2024_v1  ;;  %v2101_v32 = vmov %v2026_v3 }
  0xd0   : >> { %v2102_v3 = vmov %v2101_v32  ;;  %v2104_v1 = vmov %v2100_v31  ;;  %v1061_v52 = vmul.f32 (%p179_p5), %v1060_v45, %v2100_v31  ;;  %v1069_v11 = vmul.f32 (%p179_p5), %v1068_v53, %v2101_v32 }
  0xd1   : > { %v1079_v46 = vmul.f32 %v1078_v8, %v2100_v31  ;;  %v1087_v27 = vmul.f32 %v1086_v21, %v2101_v32  ;;  %v1097_v34 = vmul.f32 %v1096_v24, %v2100_v31  ;;  %v1105_v60 = vmul.f32 %v1104_v12, %v2101_v32 }
  0xd2   : > { %v1062_v25 = vadd.f32 %v1061_v52, %v1058_v63  ;;  %v1130_v50 = vmul.f32 %v1128_v17, %v2100_v31  ;;  %v1111_v1 = vstv %s1309_s23  ;;  %v1115_v48 = vmul.f32 %v1114_v35, %v2100_v31 }
  0xd3   : > { %v1080_v58 = vadd.f32 %v1079_v46, %v1076_v14  ;;  %v1098_v49 = vadd.f32 %v1097_v34, %v1094_v47  ;;  %v1112_v57 = vmul.f32 %v1111_v1, %v2098_v54  ;;  %v1123_v4 = vmul.f32 %v1122_v61, %v2101_v32 }
  0xd4   : > { %v1066_v15 = vadd.f32 %v1065_v9, %v1062_v25  ;;  %v1131_v54 = vmul.f32 %v1128_v17, %v2099_v16  ;;  %v1132_v52 = vmul.f32 %v1128_v17, %v2101_v32 }
  0xd5   : > { %v1084_v36 = vadd.f32 %v1083_v26, %v1080_v58  ;;  %v1102_v62 = vadd.f32 %v1101_v42, %v1098_v49  ;;  %v1116_v13 = vadd.f32 %v1115_v48, %v1112_v57 }
  0xd6   : > { %v1070_v20 = vadd.f32 %v1069_v11, %v1066_v15 }
  0xd7   : > { %v1088_v41 = vadd.f32 %v1087_v27, %v1084_v36  ;;  %v1106_v59 = vadd.f32 %v1105_v60, %v1102_v62  ;;  %v1120_v3 = vadd.f32 %v1119_v29, %v1116_v13 }
  0xd8   : > { %v1073_v6 = vadd.f32 %v1072_v2, %v1070_v20 }
  0xd9   : > { %v1091_v23 = vadd.f32 %v1090_v40, %v1088_v41  ;;  %v1109_v5 = vadd.f32 %v1108_v30, %v1106_v59  ;;  %v1124_v31 = vadd.f32 %v1123_v4, %v1120_v3 }
  0xda   : > { %v1134_v38 = vmul.f32 %v1133_v22, %v1073_v6 }
  0xdb   : > { %v1135_v39 = vmul.f32 %v1133_v22, %v1091_v23  ;;  %v1136_v55 = vmul.f32 %v1133_v22, %v1109_v5  ;;  %v1127_v45 = vadd.f32 %v1126_v18, %v1124_v31 }
  0xdc   : > { %v1138_v43 = vsub.f32 %v1129_v37, %v1134_v38 }
  0xdd   : > { %v1139_v10 = vsub.f32 %v1130_v50, %v1135_v39  ;;  %v1140_v63 = vsub.f32 %v1131_v54, %v1136_v55  ;;  %v1137_v9 = vmul.f32 %v1133_v22, %v1127_v45 }
  0xde   : > { %v1314_v51 = vclamps-f32 %v1138_v43, 1.0 }
  0xdf   : > { %v1315_v56 = vclamps-f32 %v1139_v10, 1.0  ;;  %v1316_v7 = vclamps-f32 %v1140_v63, 1.0  ;;  %v1141_v53 = vsub.f32 %v1132_v52, %v1137_v9 }
  0xe0   : > { %1150 = vst [vmem:[%s1594_s15] sm:$0x3] %v1314_v51 }
  0xe1   : > { %1151 = vst [vmem:[%s1594_s15 + $0x2] sm:$0x3] %v1315_v56  ;;  %v1317_v25 = vclamps-f32 %v1141_v53, 1.0 }
  0xe2   : > { %1152 = vst [vmem:[%s1594_s15 + $0x4] sm:$0x3] %v1316_v7 }
  0xe3   : > { %1153 = vst [vmem:[%s1594_s15 + $0x6] sm:$0x3] %v1317_v25 }
  0xe4 PF: > { %s34_s7 = sadd.s32 1, %s1490_s7   ;;  %s2106_s1 = smov %s1486_s6 }
  0xe5   : > { %p31_p6 = scmp.ge.s32.totalorder %s34_s7, 4   ;;  %s2107_s6 = smov %s2109_s2 }
  0xe7   :  { %33 = sbr.rel (!%p31_p6) target bundleno = 12 (0xc), region = 72 }

</bundles_post_ra>
